<compile_context>
chip_gen: v7x
topology: tpu7x:2x2x1
jax: 0.10.0
libtpu: 0.0.40
codegen_flags: <defaults>
</compile_context>

<pallas_src>
import jax
import jax.numpy as jnp
from jax.experimental import pallas as pl
from jax.experimental.pallas import tpu as pltpu

LANE = 128


def _round_up(x, m):
    return (x + m - 1) // m * m


def _vmem_limit_bytes():
    """Generation-aware scoped-VMEM limit: 64 MiB on 128-MiB parts (v5e/v6e),
    ~48 MiB on 64-MiB parts (v7x)."""
    phys = 128 * 1024 * 1024
    try:
        phys = int(pltpu.get_tpu_info().vmem_capacity_bytes)
    except Exception:
        pass
    return min(64 * 1024 * 1024, (phys * 3) // 4)


def _make_kernel(Nb, TH, W8, Cp, Co):
    """One grid step computes output strip `s` (TH rows) for a block of Nb images."""

    def kernel(x_ref, wf_ref, b_ref, o_ref):
        # x_ref : (Nb, H8+2, W8+2, Cp) bf16 — halo-padded input block, resident
        #         in VMEM across the strip grid axis (index_map ignores s).
        # wf_ref: (9, Cp, Co)          bf16 — fused pointwise*depthwise weights.
        # b_ref : (1, Co)              f32  — depthwise bias (lane padded).
        # o_ref : (Nb, TH, W8, Co)     f32  — per-strip output block.
        s = pl.program_id(1)
        h0 = pl.multiple_of(s * TH, 8)          # top padded-row of this strip
        bias = b_ref[...]                       # (1, Co)

        for n in range(Nb):                     # Nb is small (<= 8) and static
            acc = None
            for dw in range(3):
                # One sublane-shifted window per dw (only 2 of 3 misaligned);
                # the dh taps reuse it via cheap outer-axis row sub-slices.
                xw = x_ref[n, pl.ds(h0, TH + 2), dw:dw + W8, :]    # (TH+2, W8, Cp)
                for dh in range(3):
                    xs = xw[dh:dh + TH]                            # (TH, W8, Cp)
                    part = jnp.dot(xs.reshape(TH * W8, Cp),
                                   wf_ref[dh * 3 + dw],
                                   preferred_element_type=jnp.float32)
                    acc = part if acc is None else acc + part
            out = (acc + bias).reshape(TH, W8, Co)
            o_ref[n] = out.astype(o_ref.dtype)

    return kernel


def bsconvu(x_nchw, w_pw, w_dw, b_dw):
    """x_nchw: (N, Cin, H, W); w_pw: (Cout, Cin, 1, 1); w_dw: (Cout, 1, 3, 3);
    b_dw: (Cout,).  Returns (N, Cout, H, W), matching the PyTorch module."""
    N, Cin, H, W = x_nchw.shape
    Cout = w_pw.shape[0]
    Cp = _round_up(Cin, LANE)
    Co = _round_up(Cout, LANE)
    H8 = _round_up(H, 8)
    W8 = _round_up(W, 8)

    # ---- lane-dense, halo-padded NHWC input in bf16 -------------------------
    # 1-pixel halo on each side; extra zero rows/cols up to H8/W8 (sliced off
    # after the call); channels zero-padded to a lane multiple.
    x = jnp.transpose(x_nchw, (0, 2, 3, 1)).astype(jnp.bfloat16)
    x = jnp.pad(x, ((0, 0), (1, 1 + H8 - H), (1, 1 + W8 - W), (0, Cp - Cin)))

    # ---- fuse the two convs: wf[k, c, o] = w_pw[c, o] * w_dw[kh, kw, o] ------
    wpw = jnp.transpose(w_pw[:, :, 0, 0], (1, 0))             # (Cin, Cout)
    wdw = jnp.transpose(w_dw[:, 0, :, :], (1, 2, 0))          # (3, 3, Cout)
    wf = (wpw[None, None, :, :] * wdw[:, :, None, :]).reshape(9, Cin, Cout)
    wf = jnp.pad(wf, ((0, 0), (0, Cp - Cin), (0, Co - Cout))).astype(jnp.bfloat16)
    b = jnp.pad(b_dw, (0, Co - Cout)).reshape(1, Co).astype(jnp.float32)

    vmem_limit = _vmem_limit_bytes()

    # ---- strip height: target M = TH*W8 around 256 (wide-MXU friendly) while
    #      keeping the f32 accumulator (TH*W8, Co) <= ~128 KiB. -----------------
    cap_m = max(8 * W8, min(512, (128 * 1024) // (Co * 4)))
    TH = 8
    for t in range(8, H8 + 1, 8):
        if H8 % t == 0 and t * W8 <= cap_m:
            TH = t
    n_strips = H8 // TH

    # ---- batch blocking from the VMEM budget (double-buffered in/out blocks),
    #      but keep >= 2 total grid steps so both v7x TensorCores get work. -----
    per_elem = 2 * (H8 + 2) * (W8 + 2) * Cp * 2 + 2 * TH * W8 * Co * 4
    budget = (vmem_limit * 3) // 5
    Nb = max(1, min(N, budget // max(per_elem, 1), 8))
    Ng = -(-N // Nb)
    if Ng * n_strips < 2 and N > 1:
        Nb = -(-N // 2)
        Ng = -(-N // Nb)
    Np = Ng * Nb
    if Np != N:
        x = jnp.pad(x, ((0, Np - N), (0, 0), (0, 0), (0, 0)))

    # ---- guard: blocks must fit the scoped VMEM limit ------------------------
    need = (2 * Nb * (H8 + 2) * (W8 + 2) * Cp * 2      # input (double-buffered)
            + 2 * Nb * TH * W8 * Co * 4                # output (double-buffered)
            + 2 * 9 * Cp * Co * 2 + 2 * Co * 4)        # weights + bias
    if need > vmem_limit:
        raise ValueError(
            f"BSConvU blocks need {need} B VMEM > limit {vmem_limit} B; "
            "tile H of the input (see TODO) for images this large.")

    kernel = _make_kernel(Nb, TH, W8, Cp, Co)

    out = pl.pallas_call(
        kernel,
        out_shape=jax.ShapeDtypeStruct((Np, H8, W8, Co), jnp.float32),
        grid_spec=pltpu.PrefetchScalarGridSpec(
            num_scalar_prefetch=0,
            grid=(Ng, n_strips),
            in_specs=[
                # Whole padded image block, resident in VMEM across the strip axis.
                pl.BlockSpec((Nb, H8 + 2, W8 + 2, Cp), lambda g, s: (g, 0, 0, 0)),
                pl.BlockSpec((9, Cp, Co), lambda g, s: (0, 0, 0)),
                pl.BlockSpec((1, Co), lambda g, s: (0, 0)),
            ],
            # Per-strip output block -> writeback of strip s-1 overlaps strip s.
            out_specs=pl.BlockSpec((Nb, TH, W8, Co), lambda g, s: (g, s, 0, 0)),
        ),
        compiler_params=pltpu.CompilerParams(
            dimension_semantics=("parallel", "parallel"),
            vmem_limit_bytes=vmem_limit,
        ),
    )(x, wf, b)

    out = out[:N, :H, :W, :Cout]                               # drop all padding
    return jnp.transpose(out, (0, 3, 1, 2)).astype(x_nchw.dtype)   # back to NCHW


def bsconvu_reference(x, w_pw, w_dw, b_dw):
    """Pure-JAX f32 reference matching torch Conv2d semantics (NCHW / OIHW)."""
    pw = jax.lax.conv_general_dilated(
        x, w_pw, window_strides=(1, 1), padding="VALID",
        dimension_numbers=("NCHW", "OIHW", "NCHW"))
    dw = jax.lax.conv_general_dilated(
        pw, w_dw, window_strides=(1, 1), padding=((1, 1), (1, 1)),
        dimension_numbers=("NCHW", "OIHW", "NCHW"),
        feature_group_count=w_dw.shape[0])
    return dw + b_dw[None, :, None, None]


def _run_case(key, N, Cin, Cout, H, W):
    kx, kpw, kdw, kb = jax.random.split(key, 4)
    x = jax.random.normal(kx, (N, Cin, H, W), dtype=jnp.float32)
    # Deterministic synthetic parameters (shapes per nn.Conv2d in the module).
    w_pw = 0.1 * jax.random.normal(kpw, (Cout, Cin, 1, 1), dtype=jnp.float32)
    w_dw = 0.1 * jax.random.normal(kdw, (Cout, 1, 3, 3), dtype=jnp.float32)
    b_dw = 0.1 * jax.random.normal(kb, (Cout,), dtype=jnp.float32)

    out = jax.jit(bsconvu)(x, w_pw, w_dw, b_dw)
    out = jax.block_until_ready(out)

    ref = bsconvu_reference(x, w_pw, w_dw, b_dw)
    assert out.shape == (N, Cout, H, W)
    # bf16 MXU inputs (f32 accumulation) -> loosened tolerance vs. f32 reference.
    assert jnp.allclose(out, ref, atol=5e-2, rtol=5e-2), "mismatch vs reference"


if __name__ == "__main__":
    key = jax.random.PRNGKey(0)
    k1, k2 = jax.random.split(key)
    # Primary small case (grid = (2, 1): batch-parallel steps).
    _run_case(k1, N=2, Cin=4, Cout=8, H=16, W=16)
    # Odd height + multi-strip case (grid = (1, 3): strip-parallel, Nb = 3).
    _run_case(k2, N=3, Cin=31, Cout=60, H=20, W=24)
    print("KERNEL_OK")
</pallas_src>

<mosaic_0001>
module attributes {stable_mosaic.version = 11 : i64} {
  func.func @kernel(%arg0: i32, %arg1: i32, %arg2: memref<1x18x18x128xbf16, #tpu.memory_space<vmem>>, %arg3: memref<9x128x128xbf16, #tpu.memory_space<vmem>>, %arg4: memref<1x128xf32, #tpu.memory_space<vmem>>, %arg5: memref<1x16x16x128xf32, #tpu.memory_space<vmem>>) attributes {dimension_semantics = [#tpu.dimension_semantics<parallel>, #tpu.dimension_semantics<parallel>], iteration_bounds = array<i64: 2, 1>, scalar_prefetch = 0 : i64, scratch_operands = 0 : i64, tpu.core_type = #tpu.core_type<tc>, window_params = [{transform_indices = @transform_0, window_bounds = array<i64: 1, 18, 18, 128>}, {pipeline_mode = #tpu.pipeline_mode<synchronous>, transform_indices = @transform_1, window_bounds = array<i64: 9, 128, 128>}, {pipeline_mode = #tpu.pipeline_mode<synchronous>, transform_indices = @transform_2, window_bounds = array<i64: 1, 128>}, {transform_indices = @transform_3, window_bounds = array<i64: 1, 16, 16, 128>}]} {
    %c16_i32 = arith.constant 16 : i32
    %0 = arith.muli %arg1, %c16_i32 : i32
    %1 = tpu.assume_multiple %0, 8 : i32
    %c0 = arith.constant 0 : index
    %c0_0 = arith.constant 0 : index
    %2 = vector.load %arg4[%c0, %c0_0] : memref<1x128xf32, #tpu.memory_space<vmem>>, vector<1x128xf32>
    %c0_1 = arith.constant 0 : index
    %3 = arith.index_cast %1 : i32 to index
    %c0_2 = arith.constant 0 : index
    %c0_3 = arith.constant 0 : index
    %4 = vector.load %arg2[%c0_1, %3, %c0_2, %c0_3] : memref<1x18x18x128xbf16, #tpu.memory_space<vmem>>, vector<1x18x16x128xbf16>
    %5 = vector.shape_cast %4 : vector<1x18x16x128xbf16> to vector<18x16x128xbf16>
    %6 = vector.extract_strided_slice %5 {offsets = [0, 0, 0], sizes = [16, 16, 128], strides = [1, 1, 1]} : vector<18x16x128xbf16> to vector<16x16x128xbf16>
    %7 = vector.shape_cast %6 : vector<16x16x128xbf16> to vector<256x128xbf16>
    %c0_4 = arith.constant 0 : index
    %c0_5 = arith.constant 0 : index
    %c0_6 = arith.constant 0 : index
    %8 = vector.load %arg3[%c0_4, %c0_5, %c0_6] : memref<9x128x128xbf16, #tpu.memory_space<vmem>>, vector<1x128x128xbf16>
    %9 = vector.shape_cast %8 : vector<1x128x128xbf16> to vector<128x128xbf16>
    %cst = arith.constant dense<0.000000e+00> : vector<256x128xf32>
    %10 = tpu.matmul %7, %9, %cst {dimension_numbers = #tpu.dot_dimension_numbers<[1], [0], [0], [1], [0, 0, 1, 1], [], []>} : vector<256x128xbf16>, vector<128x128xbf16>, vector<256x128xf32> -> vector<256x128xf32>
    %11 = vector.extract_strided_slice %5 {offsets = [1, 0, 0], sizes = [16, 16, 128], strides = [1, 1, 1]} : vector<18x16x128xbf16> to vector<16x16x128xbf16>
    %12 = vector.shape_cast %11 : vector<16x16x128xbf16> to vector<256x128xbf16>
    %c3 = arith.constant 3 : index
    %c0_7 = arith.constant 0 : index
    %c0_8 = arith.constant 0 : index
    %13 = vector.load %arg3[%c3, %c0_7, %c0_8] : memref<9x128x128xbf16, #tpu.memory_space<vmem>>, vector<1x128x128xbf16>
    %14 = vector.shape_cast %13 : vector<1x128x128xbf16> to vector<128x128xbf16>
    %cst_9 = arith.constant dense<0.000000e+00> : vector<256x128xf32>
    %15 = tpu.matmul %12, %14, %cst_9 {dimension_numbers = #tpu.dot_dimension_numbers<[1], [0], [0], [1], [0, 0, 1, 1], [], []>} : vector<256x128xbf16>, vector<128x128xbf16>, vector<256x128xf32> -> vector<256x128xf32>
    %16 = arith.addf %10, %15 : vector<256x128xf32>
    %17 = vector.extract_strided_slice %5 {offsets = [2, 0, 0], sizes = [16, 16, 128], strides = [1, 1, 1]} : vector<18x16x128xbf16> to vector<16x16x128xbf16>
    %18 = vector.shape_cast %17 : vector<16x16x128xbf16> to vector<256x128xbf16>
    %c6 = arith.constant 6 : index
    %c0_10 = arith.constant 0 : index
    %c0_11 = arith.constant 0 : index
    %19 = vector.load %arg3[%c6, %c0_10, %c0_11] : memref<9x128x128xbf16, #tpu.memory_space<vmem>>, vector<1x128x128xbf16>
    %20 = vector.shape_cast %19 : vector<1x128x128xbf16> to vector<128x128xbf16>
    %cst_12 = arith.constant dense<0.000000e+00> : vector<256x128xf32>
    %21 = tpu.matmul %18, %20, %cst_12 {dimension_numbers = #tpu.dot_dimension_numbers<[1], [0], [0], [1], [0, 0, 1, 1], [], []>} : vector<256x128xbf16>, vector<128x128xbf16>, vector<256x128xf32> -> vector<256x128xf32>
    %22 = arith.addf %16, %21 : vector<256x128xf32>
    %c0_13 = arith.constant 0 : index
    %23 = arith.index_cast %1 : i32 to index
    %c1 = arith.constant 1 : index
    %c0_14 = arith.constant 0 : index
    %24 = vector.load %arg2[%c0_13, %23, %c1, %c0_14] : memref<1x18x18x128xbf16, #tpu.memory_space<vmem>>, vector<1x18x16x128xbf16>
    %25 = vector.shape_cast %24 : vector<1x18x16x128xbf16> to vector<18x16x128xbf16>
    %26 = vector.extract_strided_slice %25 {offsets = [0, 0, 0], sizes = [16, 16, 128], strides = [1, 1, 1]} : vector<18x16x128xbf16> to vector<16x16x128xbf16>
    %27 = vector.shape_cast %26 : vector<16x16x128xbf16> to vector<256x128xbf16>
    %c1_15 = arith.constant 1 : index
    %c0_16 = arith.constant 0 : index
    %c0_17 = arith.constant 0 : index
    %28 = vector.load %arg3[%c1_15, %c0_16, %c0_17] : memref<9x128x128xbf16, #tpu.memory_space<vmem>>, vector<1x128x128xbf16>
    %29 = vector.shape_cast %28 : vector<1x128x128xbf16> to vector<128x128xbf16>
    %cst_18 = arith.constant dense<0.000000e+00> : vector<256x128xf32>
    %30 = tpu.matmul %27, %29, %cst_18 {dimension_numbers = #tpu.dot_dimension_numbers<[1], [0], [0], [1], [0, 0, 1, 1], [], []>} : vector<256x128xbf16>, vector<128x128xbf16>, vector<256x128xf32> -> vector<256x128xf32>
    %31 = arith.addf %22, %30 : vector<256x128xf32>
    %32 = vector.extract_strided_slice %25 {offsets = [1, 0, 0], sizes = [16, 16, 128], strides = [1, 1, 1]} : vector<18x16x128xbf16> to vector<16x16x128xbf16>
    %33 = vector.shape_cast %32 : vector<16x16x128xbf16> to vector<256x128xbf16>
    %c4 = arith.constant 4 : index
    %c0_19 = arith.constant 0 : index
    %c0_20 = arith.constant 0 : index
    %34 = vector.load %arg3[%c4, %c0_19, %c0_20] : memref<9x128x128xbf16, #tpu.memory_space<vmem>>, vector<1x128x128xbf16>
    %35 = vector.shape_cast %34 : vector<1x128x128xbf16> to vector<128x128xbf16>
    %cst_21 = arith.constant dense<0.000000e+00> : vector<256x128xf32>
    %36 = tpu.matmul %33, %35, %cst_21 {dimension_numbers = #tpu.dot_dimension_numbers<[1], [0], [0], [1], [0, 0, 1, 1], [], []>} : vector<256x128xbf16>, vector<128x128xbf16>, vector<256x128xf32> -> vector<256x128xf32>
    %37 = arith.addf %31, %36 : vector<256x128xf32>
    %38 = vector.extract_strided_slice %25 {offsets = [2, 0, 0], sizes = [16, 16, 128], strides = [1, 1, 1]} : vector<18x16x128xbf16> to vector<16x16x128xbf16>
    %39 = vector.shape_cast %38 : vector<16x16x128xbf16> to vector<256x128xbf16>
    %c7 = arith.constant 7 : index
    %c0_22 = arith.constant 0 : index
    %c0_23 = arith.constant 0 : index
    %40 = vector.load %arg3[%c7, %c0_22, %c0_23] : memref<9x128x128xbf16, #tpu.memory_space<vmem>>, vector<1x128x128xbf16>
    %41 = vector.shape_cast %40 : vector<1x128x128xbf16> to vector<128x128xbf16>
    %cst_24 = arith.constant dense<0.000000e+00> : vector<256x128xf32>
    %42 = tpu.matmul %39, %41, %cst_24 {dimension_numbers = #tpu.dot_dimension_numbers<[1], [0], [0], [1], [0, 0, 1, 1], [], []>} : vector<256x128xbf16>, vector<128x128xbf16>, vector<256x128xf32> -> vector<256x128xf32>
    %43 = arith.addf %37, %42 : vector<256x128xf32>
    %c0_25 = arith.constant 0 : index
    %44 = arith.index_cast %1 : i32 to index
    %c2 = arith.constant 2 : index
    %c0_26 = arith.constant 0 : index
    %45 = vector.load %arg2[%c0_25, %44, %c2, %c0_26] : memref<1x18x18x128xbf16, #tpu.memory_space<vmem>>, vector<1x18x16x128xbf16>
    %46 = vector.shape_cast %45 : vector<1x18x16x128xbf16> to vector<18x16x128xbf16>
    %47 = vector.extract_strided_slice %46 {offsets = [0, 0, 0], sizes = [16, 16, 128], strides = [1, 1, 1]} : vector<18x16x128xbf16> to vector<16x16x128xbf16>
    %48 = vector.shape_cast %47 : vector<16x16x128xbf16> to vector<256x128xbf16>
    %c2_27 = arith.constant 2 : index
    %c0_28 = arith.constant 0 : index
    %c0_29 = arith.constant 0 : index
    %49 = vector.load %arg3[%c2_27, %c0_28, %c0_29] : memref<9x128x128xbf16, #tpu.memory_space<vmem>>, vector<1x128x128xbf16>
    %50 = vector.shape_cast %49 : vector<1x128x128xbf16> to vector<128x128xbf16>
    %cst_30 = arith.constant dense<0.000000e+00> : vector<256x128xf32>
    %51 = tpu.matmul %48, %50, %cst_30 {dimension_numbers = #tpu.dot_dimension_numbers<[1], [0], [0], [1], [0, 0, 1, 1], [], []>} : vector<256x128xbf16>, vector<128x128xbf16>, vector<256x128xf32> -> vector<256x128xf32>
    %52 = arith.addf %43, %51 : vector<256x128xf32>
    %53 = vector.extract_strided_slice %46 {offsets = [1, 0, 0], sizes = [16, 16, 128], strides = [1, 1, 1]} : vector<18x16x128xbf16> to vector<16x16x128xbf16>
    %54 = vector.shape_cast %53 : vector<16x16x128xbf16> to vector<256x128xbf16>
    %c5 = arith.constant 5 : index
    %c0_31 = arith.constant 0 : index
    %c0_32 = arith.constant 0 : index
    %55 = vector.load %arg3[%c5, %c0_31, %c0_32] : memref<9x128x128xbf16, #tpu.memory_space<vmem>>, vector<1x128x128xbf16>
    %56 = vector.shape_cast %55 : vector<1x128x128xbf16> to vector<128x128xbf16>
    %cst_33 = arith.constant dense<0.000000e+00> : vector<256x128xf32>
    %57 = tpu.matmul %54, %56, %cst_33 {dimension_numbers = #tpu.dot_dimension_numbers<[1], [0], [0], [1], [0, 0, 1, 1], [], []>} : vector<256x128xbf16>, vector<128x128xbf16>, vector<256x128xf32> -> vector<256x128xf32>
    %58 = arith.addf %52, %57 : vector<256x128xf32>
    %59 = vector.extract_strided_slice %46 {offsets = [2, 0, 0], sizes = [16, 16, 128], strides = [1, 1, 1]} : vector<18x16x128xbf16> to vector<16x16x128xbf16>
    %60 = vector.shape_cast %59 : vector<16x16x128xbf16> to vector<256x128xbf16>
    %c8 = arith.constant 8 : index
    %c0_34 = arith.constant 0 : index
    %c0_35 = arith.constant 0 : index
    %61 = vector.load %arg3[%c8, %c0_34, %c0_35] : memref<9x128x128xbf16, #tpu.memory_space<vmem>>, vector<1x128x128xbf16>
    %62 = vector.shape_cast %61 : vector<1x128x128xbf16> to vector<128x128xbf16>
    %cst_36 = arith.constant dense<0.000000e+00> : vector<256x128xf32>
    %63 = tpu.matmul %60, %62, %cst_36 {dimension_numbers = #tpu.dot_dimension_numbers<[1], [0], [0], [1], [0, 0, 1, 1], [], []>} : vector<256x128xbf16>, vector<128x128xbf16>, vector<256x128xf32> -> vector<256x128xf32>
    %64 = arith.addf %58, %63 : vector<256x128xf32>
    %65 = vector.broadcast %2 : vector<1x128xf32> to vector<256x128xf32>
    %66 = arith.addf %64, %65 : vector<256x128xf32>
    %67 = vector.shape_cast %66 : vector<256x128xf32> to vector<16x16x128xf32>
    %c0_37 = arith.constant 0 : index
    %c0_38 = arith.constant 0 : index
    %c0_39 = arith.constant 0 : index
    %c0_40 = arith.constant 0 : index
    %68 = vector.load %arg5[%c0_37, %c0_38, %c0_39, %c0_40] : memref<1x16x16x128xf32, #tpu.memory_space<vmem>>, vector<1x16x16x128xf32>
    %69 = vector.shape_cast %68 : vector<1x16x16x128xf32> to vector<16x16x128xf32>
    %70 = vector.shape_cast %67 : vector<16x16x128xf32> to vector<1x16x16x128xf32>
    tpu.vector_store %arg5[%c0_37, %c0_38, %c0_39, %c0_40], %70 {strides = array<i32>} : memref<1x16x16x128xf32, #tpu.memory_space<vmem>>, vector<1x16x16x128xf32>,
    return
  }
  func.func @transform_0(%arg0: i32, %arg1: i32) -> (i32, i32, i32, i32) {
    %c0_i32 = arith.constant 0 : i32
    %c0_i32_0 = arith.constant 0 : i32
    %c0_i32_1 = arith.constant 0 : i32
    %c0_i32_2 = arith.constant 0 : i32
    return %arg0, %c0_i32, %c0_i32_0, %c0_i32_1 : i32, i32, i32, i32
  }
  func.func @transform_1(%arg0: i32, %arg1: i32) -> (i32, i32, i32) {
    %c0_i32 = arith.constant 0 : i32
    %c0_i32_0 = arith.constant 0 : i32
    %c0_i32_1 = arith.constant 0 : i32
    %c0_i32_2 = arith.constant 0 : i32
    return %c0_i32, %c0_i32_0, %c0_i32_1 : i32, i32, i32
  }
  func.func @transform_2(%arg0: i32, %arg1: i32) -> (i32, i32) {
    %c0_i32 = arith.constant 0 : i32
    %c0_i32_0 = arith.constant 0 : i32
    %c0_i32_1 = arith.constant 0 : i32
    return %c0_i32, %c0_i32_0 : i32, i32
  }
  func.func @transform_3(%arg0: i32, %arg1: i32) -> (i32, i32, i32, i32) {
    %c0_i32 = arith.constant 0 : i32
    %c0_i32_0 = arith.constant 0 : i32
    %c0_i32_1 = arith.constant 0 : i32
    return %arg0, %arg1, %c0_i32, %c0_i32_0 : i32, i32, i32, i32
  }
}

</mosaic_0001>

<bundles_post_ra>
// kernel: bsconvu.1
= control target key start
LH: loop header
LB: loop body
LE: loop exit
PB: predicated region body
PF: predicated region fallthrough
CT: control target
= control target key end

     0   :  { %8 = vsyncpa [#allocation3], 0  ;;  %s6228_s0 = inlined_call_operand.hbm [shape: bf16[2,18,18,128], index: 0, kind: input, shape index: {}]   ;;  %s6229_s1 = inlined_call_operand.hbm [shape: bf16[9,128,128], index: 1, kind: input, shape index: {}]   ;;  %s6230_s2 = inlined_call_operand.hbm [shape: f32[1,128], index: 2, kind: input, shape index: {}]   ;;  %s6231_s3 = inlined_call_operand.hbm [shape: f32[2,16,16,128], index: 3, kind: output, shape index: {}]  }
   0x1   :  { %10 = vsyncpa [#allocation3 + $0x1], 0 }
   0x2   :  { %11 = vsyncpa [#allocation6], 0 }
   0x3   :  { %12 = vsyncpa [#allocation4], 0 }
   0x4   :  { %14 = vsyncpa [#allocation4 + $0x1], 0  ;;  %s5155_s12 = smov 0   ;;  %s5157_s13 = smov 0  }
   0x5   :  { %s5159_s14 = smov 0   ;;  %s5161_s15 = smov 0  }
   0x6   :  { %s5163_s16 = smov 0   ;;  %s5165_s17 = smov 0  }
   0x7 LB: > { %s3664_s18 = sadd.s32 4294967295, %s5125_s17   ;;  %s3665_s19 = sadd.s32 4294967294, %s5125_s17   ;;  %s5125_s17 = sphi %s5165_s17, %s20_s17   ;;  %s5121_s16 = sphi %s5163_s16, %s6354_s16   ;;  %s5117_s15 = sphi %s5161_s15, %s6353_s15   ;;  %s5113_s14 = sphi %s5159_s14, %s6352_s14   ;;  %s5109_s13 = sphi %s5157_s13, %s6351_s13   ;;  %s5105_s12 = sphi %s5155_s12, %s6350_s12  }
   0x8   : > { %p52_p0 = scmp.ne.s32.totalorder %s5109_s13, %s5105_s12  ;;  %p5189_p1 = scmp.eq.s32.totalorder %s3664_s18, 0 }
   0x9   : > { %p5193_p2 = scmp.eq.s32.totalorder %s3664_s18, 1  ;;  %p126_p3 = scmp.eq.s32.totalorder %s3665_s19, 1 }
   0xa   : > { %s6273_s20 = scalar_select %p5189_p1, 1, 0 }
   0xb   : > { %p5199_p4 = por %p5189_p1, %p52_p0  ;;  %p3666_p5 = scmp.ge.s32.totalorder %s5125_s17, 1 }
   0xc   : > { %p5204_p6 = por %p126_p3, %p52_p0  ;;  %p133_p7 = scmp.lt.s32.totalorder %s5125_s17, 3 }
   0xd   : > { %s6275_s22 = scalar_select %p5199_p4, 1, 0 }
   0xe   : > { %s6276_s23 = scalar_select %p5204_p6, 1, 0 }
   0xf   : > { %p5209_p8 = pnand %p3666_p5, %p133_p7  ;;  %s5127_s25 = smov [#allocation5]  }
  0x10   : > { %s145_s26 = sshll.u32 %s5127_s25, 4  ;;  %s5128_s28 = smov [#allocation7]   ;;  %s5213_s26 = int_to_ptr.vmem [resolvable:$true] %s145_s26 }
  0x11   : > { %p4761_p9 = pneg %p5209_p8  ;;  %s159_s29 = sshll.u32 %s5128_s28, 4  ;;  %s5224_s29 = int_to_ptr.vmem [resolvable:$true] %s159_s29 }
  0x12   : > { %s4953_s5 = scalar_lea.hbm %s6229_s1, 9216 }
  0x13   : > { %p5220_p11 = pnand %p4761_p9, %p5189_p1  ;;  %p4954_p12 = scmp.ne.s32.totalorder %s6229_s1, %s4953_s5 }
  0x14   : > { %p4960_p5 = scmp.lt.u32.totalorder %s4953_s5, %s6229_s1 }
  0x15   : > { %p4955_p13 = pneg %p5220_p11 }
  0x17   : > { %p4956_p0 = pnand %p4955_p13, %p4954_p12 }
  0x19   : > { %p4957_p3 = pneg %p4956_p0 }
  0x1b   : > { %p4962_p7 = pnand %p4960_p5, %p4957_p3 }
  0x1d   : > { %4965 = shalt.err (!%p4962_p7)
}
  0x1e   : > { %s4966_s10 = scalar_lea.vmem %s5213_s26, 9216  ;;  %p4974_p1 = scmp.lt.s32.totalorder %s5213_s26, %s5213_s26 }
  0x1f   : > { %p4967_p9 = scmp.ne.s32.totalorder %s5213_s26, %s4966_s10  ;;  %p4975_p12 = scmp.lt.s32.totalorder %s4966_s10, %s4966_s10 }
  0x21   : > { %p4969_p10 = pnand %p4967_p9, %p4955_p13  ;;  %p4976_p0 = por %p4975_p12, %p4974_p1 }
  0x23   : > { %p4970_p6 = pneg %p4969_p10 }
  0x25   : > { %p4977_p4 = pnand %p4976_p0, %p4970_p6 }
  0x27   : > { %4980 = shalt.err (!%p4977_p4)
}
  0x28   : > { %s5129_s11 = smov 64   ;;  %s5130_s18 = smov 4  }
  0x29   : > { %4764 = dma.hbm_to_vmem [thread:$0]  (!%p5220_p11), %s6229_s1, 9216, %s5213_s26, [#allocation6], %s5129_s11, %s5129_s11, %s5130_s18  }
  0x2a   : > { %s4981_s4 = scalar_lea.hbm %s6230_s2, 16 }
  0x2b   : > { %p4982_p1 = scmp.ne.s32.totalorder %s6230_s2, %s4981_s4  ;;  %p4988_p10 = scmp.lt.u32.totalorder %s4981_s4, %s6230_s2 }
  0x2d   : > { %p4984_p4 = pnand %p4982_p1, %p4955_p13 }
  0x2f   : > { %p4985_p6 = pneg %p4984_p4 }
  0x31   : > { %p4990_p3 = pnand %p4988_p10, %p4985_p6 }
  0x33   : > { %4993 = shalt.err (!%p4990_p3)
}
  0x34   : > { %s4994_s26 = scalar_lea.vmem %s5224_s29, 16  ;;  %s5001_s9 = scalar_lea.vmem %s5224_s29, 32 }
  0x35   : > { %p4995_p5 = scmp.ne.s32.totalorder %s5224_s29, %s4994_s26  ;;  %p5002_p12 = scmp.lt.s32.totalorder %s5224_s29, %s5224_s29 }
  0x36   : > { %p5003_p0 = scmp.lt.s32.totalorder %s5001_s9, %s4994_s26 }
  0x37   : > { %p4997_p7 = pnand %p4995_p5, %p4955_p13 }
  0x38   : > { %p5004_p1 = por %p5003_p0, %p5002_p12 }
  0x39   : > { %p4998_p9 = pneg %p4997_p7 }
  0x3b   : > { %p5005_p4 = pnand %p5004_p1, %p4998_p9 }
  0x3d   : > { %5008 = shalt.err (!%p5005_p4)
}
  0x3e   : > { %4767 = dma.hbm_to_vmem [thread:$0]  (!%p5220_p11), %s6230_s2, 16, %s5224_s29, [#allocation6]  }
  0x3f   : > { %s32_s25 = sadd.s32 1, %s5121_s16  ;;  %s39_s28 = sadd.s32 1, %s5113_s14 }
  0x40   : > { %p34_p13 = scmp.ge.s32.totalorder %s32_s25, 2  ;;  %p46_p6 = scmp.ne.s32.totalorder %s5113_s14, %s5109_s13 }
  0x41   : > { %p47_p10 = scmp.eq.s32.totalorder %s5125_s17, 0  ;;  %p4778_p3 = scmp.lt.s32.totalorder %s5125_s17, 2 }
  0x42   : > { %s6356_s25 = smov (%p34_p13, %s32_s25), 0  ;;  %p5292_p7 = por %p5193_p2, %p46_p6 }
  0x43   : > { %p48_p5 = por %p47_p10, %p46_p6  ;;  %s36_s30 = ssub.s32 %s5121_s16, %s6356_s25 }
  0x44   : > { %s6279_s27 = scalar_select %p5292_p7, 1, 0 }
  0x45   : > { %s170_s4 = sand.u32 1, %s5113_s14   ;;  %p37_p9 = scmp.eq.s32.totalorder %s36_s30, 0 }
  0x46   : > { %s4746_s29 = smul.u32 216, %s170_s4  ;;  %p5299_p11 = pnand %p4778_p3, %p48_p5 }
  0x47   : > { %s5304_s6 = scalar_select %p37_p9, %s5113_s14, %s39_s28  }
  0x48   : > { %s4747_s7 = smul.u32 3456, %s5121_s16  ;;  %s174_s8 = scalar_lea.vmem [#allocation2], %s4746_s29 }
  0x49   : > { %s181_s26 = sshll.u32 %s174_s8, 4  ;;  %s5314_s19 = scalar_lea.sflag [#allocation3], %s170_s4  ;;  %s5312_s26 = int_to_ptr.vmem [resolvable:$true] %s181_s26 }
  0x4a   : > { %s5310_s10 = scalar_lea.hbm %s6228_s0, %s4747_s7  ;;  %p5011_p12 = pneg %p5299_p11 }
  0x4b   : > { %s5009_s30 = scalar_lea.hbm %s5310_s10, 3456  ;;  %s5014_s7 = scalar_lea.hbm %s6228_s0, 6912 }
  0x4c   : > { %p5010_p2 = scmp.ne.s32.totalorder %s5310_s10, %s5009_s30  ;;  %p5015_p4 = scmp.lt.u32.totalorder %s5310_s10, %s6228_s0 }
  0x4d   : > { %p5016_p13 = scmp.lt.u32.totalorder %s5014_s7, %s5009_s30  ;;  %p5018_p10 = scmp.lt.u32.totalorder %s5009_s30, %s5310_s10 }
  0x4e   : > { %p5012_p0 = pnand %p5011_p12, %p5010_p2 }
  0x4f   : > { %p5017_p6 = por %p5016_p13, %p5015_p4 }
  0x50   : > { %p5013_p1 = pneg %p5012_p0 }
  0x51   : > { %p5019_p3 = por %p5018_p10, %p5017_p6 }
  0x53   : > { %p5020_p5 = pnand %p5019_p3, %p5013_p1 }
  0x55   : > { %5023 = shalt.err (!%p5020_p5)
}
  0x56   : > { %s5024_s4 = scalar_lea.vmem %s5312_s26, 3456  ;;  %s5131_s9 = smov [#allocation2]  }
  0x57   : > { %p5025_p9 = scmp.ne.s32.totalorder %s5312_s26, %s5024_s4  ;;  %s5029_s28 = sshll.u32 %s5131_s9, 4  ;;  %s5030_s28 = int_to_ptr.vmem [resolvable:$false] %s5029_s28 }
  0x58   : > { %s5031_s29 = scalar_lea.vmem %s5030_s28, 6912  ;;  %p5032_p7 = scmp.lt.s32.totalorder %s5312_s26, %s5030_s28 }
  0x59   : > { %p5027_p2 = pnand %p5025_p9, %p5011_p12  ;;  %p5033_p4 = scmp.lt.s32.totalorder %s5031_s29, %s5024_s4 }
  0x5b   : > { %p5028_p0 = pneg %p5027_p2  ;;  %p5034_p13 = por %p5033_p4, %p5032_p7 }
  0x5d   : > { %p5035_p6 = pnand %p5034_p13, %p5028_p0 }
  0x5f   : > { %5038 = shalt.err (!%p5035_p6)
}
  0x60   : > { %4771 = dma.hbm_to_vmem [thread:$0]  (!%p5299_p11), %s5310_s10, 3456, %s5312_s26, %s5314_s19, %s5129_s11, %s5129_s11, %s5130_s18  }
  0x61   : > { %193 = sbr.rel (%p5209_p8) target bundleno = 662 (0x296), region = 32 }
  0x68   : > { %s5348_s30 = sand.u32 1, %s5109_s13   ;;  %p6281_p7 = scmp.ne.s32.totalorder %s6275_s22, 0 }
  0x69   : > { %s4748_s7 = smul.u32 216, %s5348_s30  ;;  %s196_s8 = scalar_lea.sflag [#allocation3], %s5348_s30 }
  0x6b   : > { %s5352_s21 = scalar_lea.vmem [#allocation2], %s4748_s7 }
  0x6c   : > { %5092 = dma.done.wait (%p6281_p7), %s196_s8, 3456  }
  0x6d   : > { %5094 = vsyncadd (%p6281_p7), %s196_s8, 4294963840  ;;  %p6282_p11 = scmp.ne.s32.totalorder %s6273_s20, 0 }
  0x6f   : > { %5096 = dma.done.wait (%p6282_p11), [#allocation6], 9232  }
  0x70   : > { %5098 = vsyncadd (%p6282_p11), [#allocation6], 4294958064  ;;  %v4836_v0 = vld [vmem:[#allocation5 + $0xc0] sm:$0xff]   ;;  %v4838_v2 = vld [vmem:[#allocation5 + $0xc8] sm:$0xff]   ;;  %vm1144_vm0 = vsmask.f32 3328 }
  0x71   : > { %v4837_v1 = vld [vmem:[#allocation5 + $0x100] sm:$0xff]   ;;  %4042 = vmatprep.subr.bf16.mxu1 %v4836_v0  ;;  %v4839_v3 = vld [vmem:[#allocation5 + $0x108] sm:$0xff]   ;;  %v4840_v4 = vld [vmem:[#allocation5 + $0xd0] sm:$0xff]   ;;  %vm1145_vm1 = vsmask.f32 7440  ;;  %vm2491_vm2 = vcmask 1042432  }
  0x72   : > { %4234 = vmatprep.subr.bf16.mxu0 %v4837_v1  ;;  %4043 = vmatpush3.bf16.msra.mxu1 %v4836_v0  ;;  %v4841_v5 = vld [vmem:[#allocation5 + $0x110] sm:$0xff]   ;;  %v4842_v6 = vld [vmem:[#allocation5 + $0xd8] sm:$0xff]   ;;  %v4844_v8 = vld [vmem:[#allocation5 + $0xe0] sm:$0xff]   ;;  %vm2492_vm3 = vcmask 1046532   ;;  %s3674_s20 = sshll.u32 %s5348_s30, 8  ;;  %s3825_s24 = sshll.u32 %s5117_s15, 12 }
  0x73   : > { %4235 = vmatpush3.bf16.msra.mxu0 %v4837_v1  ;;  %4044 = vmatprep.subr.bf16.mxu1 %v4838_v2  ;;  %v4843_v7 = vld [vmem:[#allocation5 + $0x118] sm:$0xff]   ;;  %v4845_v9 = vld [vmem:[#allocation5 + $0x120] sm:$0xff]   ;;  %v4846_v10 = vld [vmem:[#allocation5 + $0xe8] sm:$0xff]   ;;  %s6107_s22 = scalar_lea.vmem [#allocation8], %s3674_s20  ;;  %s6173_s26 = scalar_lea.hbm %s6231_s3, %s3825_s24 }
  0x74   : > { %4236 = vmatprep.subr.bf16.mxu0 %v4839_v3  ;;  %v4847_v11 = vld [vmem:[#allocation5 + $0x128] sm:$0xff]   ;;  %v4852_v12 = vld [vmem:[%s5352_s21 + $0xc] sm:$0xff]   ;;  %v1095_v15 = vld [vmem:[%s5352_s21 + $0x14] sm:$0x1]  ;;  %s3559_s11 = sshll.u32 %s6107_s22, 4  ;;  %s3543_s15 = scalar_lea.sflag [#allocation4], %s5348_s30  ;;  %s6175_s11 = int_to_ptr.vmem [resolvable:$true] %s3559_s11 }
  0x75   : > { %v1093_v13 = vld [vmem:[%s5352_s21 + $0xc] sm:$0xf]  ;;  %v5365_v14 = vld [vmem:[%s5352_s21 + $0x10] sm:$0xf]  ;;  %4058 = vmatprep.mubr.bf16.mxu1 %v4852_v12  ;;  %v1191_v21 = vshll.u32 %v1095_v15, 16  ;;  %v2506_v23 = vrot.slane %v1095_v15, 5  ;;  %vm5375_vm4 = vmor %vm2491_vm2, %vm2492_vm3 }
  0x76   : > { %4045 = vmatpush3.bf16.msra.mxu1 %v4838_v2  ;;  %v1172_v16 = vshrl.u32 %v1093_v13, 16  ;;  %v1175_v17 = vshll.u32 %v1093_v13, 16  ;;  %v1181_v18 = vshll.u32 %v5365_v14, 16  ;;  %v1185_v19 = vshrl.u32 %v5365_v14, 16  ;;  %v4848_v20 = vld [vmem:[#allocation5 + $0xf0] sm:$0xff]   ;;  %v4850_v32 = vld [vmem:[#allocation5 + $0xf8] sm:$0xff]   ;;  %vm5388_vm5 = vmor %vm1144_vm0, %vm1145_vm1 }
  0x77   : > { %4237 = vmatpush3.bf16.msra.mxu0 %v4839_v3  ;;  %4046 = vmatprep.subr.bf16.mxu1 %v4840_v4  ;;  %v6241_v22 = vrot.slane %v5365_v14, 5  ;;  %v4849_v28 = vld [vmem:[#allocation5 + $0x130] sm:$0xff]   ;;  %v1193_v29 = vrot.slane %v1191_v21, 5  ;;  %v1096_v35 = vld [vmem:[%s5352_s21 + $0x18] sm:$0xf]  ;;  %v4851_v43 = vld [vmem:[#allocation5 + $0x138] sm:$0xff]  }
  0x78   : > { %4238 = vmatprep.subr.bf16.mxu0 %v4841_v5  ;;  %v1174_v24 = vrot.slane %v1172_v16, 4  ;;  %v1177_v25 = vrot.slane %v1175_v17, 5  ;;  %v1183_v26 = vrot.slane %v1181_v18, 5  ;;  %v1187_v27 = vrot.slane %v1185_v19, 4  ;;  %v5381_v36 = vld [vmem:[%s5352_s21 + $0x1c] sm:$0xf] }
  0x79   : > { %v2505_v30 = vrot.slane %v6241_v22, 4  ;;  %v5384_v37 = vld [vmem:[%s5352_s21 + $0x20] sm:$0x1]  ;;  %v1196_v39 = vshrl.u32 %v1096_v35, 16  ;;  %v1199_v40 = vshll.u32 %v1096_v35, 16  ;;  %v1205_v41 = vshll.u32 %v5381_v36, 16 }
  0x7a   : > { %4047 = vmatpush3.bf16.msra.mxu1 %v4840_v4  ;;  %v1178_v33 = vor.u32 %v1177_v25, %v1174_v24  ;;  %v1188_v34 = vor.u32 %v1187_v27, %v1183_v26  ;;  %v1209_v42 = vshrl.u32 %v5381_v36, 16  ;;  %v1215_v46 = vshll.u32 %v5384_v37, 16  ;;  %v4854_v54 = vld [vmem:[#allocation5] sm:$0xff]   ;;  %v1099_v59 = vld [vmem:[%s5352_s21 + $0x24] sm:$0xf]  ;;  %s5039_s10 = scalar_lea.vmem %s6175_s11, 4096 }
  0x7b   : > { %4239 = vmatpush3.bf16.msra.mxu0 %v4841_v5  ;;  %4048 = vmatprep.subr.bf16.mxu1 %v4842_v6  ;;  %v5397_v47 = vsel %vm5375_vm4, %v2505_v30, %v2506_v23  ;;  %v1198_v48 = vrot.slane %v1196_v39, 4  ;;  %v1201_v49 = vrot.slane %v1199_v40, 5  ;;  %v1207_v50 = vrot.slane %v1205_v41, 5  ;;  %v5407_v60 = vld [vmem:[%s5352_s21 + $0x28] sm:$0xf]  ;;  %v5410_v61 = vld [vmem:[%s5352_s21 + $0x18] sm:$0xff]   ;;  %p5040_p8 = scmp.ne.s32.totalorder %s6175_s11, %s5039_s10 }
  0x7c   : > { %4240 = vmatprep.subr.bf16.mxu0 %v4843_v7  ;;  %v1179_v44 = vrot.slane %v1178_v33, 4  ;;  %v1189_v45 = vrot.slane %v1188_v34, 4  ;;  %v1211_v51 = vrot.slane %v1209_v42, 4  ;;  %v1217_v55 = vrot.slane %v1215_v46, 5  ;;  %v5413_v62 = vld [vmem:[%s5352_s21 + $0x2c] sm:$0x1] }
  0x7d   : > { %v1202_v57 = vor.u32 %v1201_v49, %v1198_v48  ;;  %v1220_v63 = vshrl.u32 %v1099_v59, 16  ;;  %v1223_v0 = vshll.u32 %v1099_v59, 16  ;;  %v1229_v1 = vshll.u32 %v5407_v60, 16  ;;  %v4855_v5 = vld [vmem:[#allocation5 + $0x1c0] sm:$0xff]   ;;  %v4856_v15 = vld [vmem:[#allocation5 + $0x1c8] sm:$0xff]   ;;  %p6347_p12 = scmp.ne.s32.totalorder %s6279_s27, 0 }
  0x7e   : > { %4049 = vmatpush3.bf16.msra.mxu1 %v4842_v6  ;;  %v1184_v52 = vsel %vm5388_vm5, %v1179_v44, %v1183_v26  ;;  %v1194_v53 = vsel %vm5388_vm5, %v1189_v45, %v1193_v29  ;;  %v1212_v58 = vor.u32 %v1211_v51, %v1207_v50  ;;  %v1233_v2 = vshrl.u32 %v5407_v60, 16  ;;  %v4859_v17 = vld [vmem:[#allocation5 + $0x8] sm:$0xff]   ;;  %v1102_v21 = vld [vmem:[%s5352_s21 + $0x30] sm:$0xf]  ;;  %v5430_v23 = vld [vmem:[%s5352_s21 + $0x34] sm:$0xf] }
  0x7f   : > { %4241 = vmatpush3.bf16.msra.mxu0 %v4843_v7  ;;  %4050 = vmatprep.subr.bf16.mxu1 %v4844_v8  ;;  %v5403_v56 = vcombine.low %v1184_v52, %v1194_v53  ;;  %v1203_v3 = vrot.slane %v1202_v57, 4  ;;  %v1239_v6 = vshll.u32 %v5413_v62, 16  ;;  %v5420_v7 = vld [vmem:[%s5352_s21 + $0x24] sm:$0xff]   ;;  %v5433_v24 = vld [vmem:[%s5352_s21 + $0x38] sm:$0x1]  ;;  %v1244_v25 = vshrl.u32 %v1102_v21, 16  ;;  %p5041_p1 = pnand %p5040_p8, %p6347_p12 }
  0x80   : > { %4242 = vmatprep.subr.bf16.mxu0 %v4845_v9  ;;  %v1213_v4 = vrot.slane %v1212_v58, 4  ;;  %v1247_v26 = vshll.u32 %v1102_v21, 16  ;;  %v1253_v27 = vshll.u32 %v5430_v23, 16  ;;  %v5446_v42 = vld [vmem:[%s5352_s21 + $0x30] sm:$0xff]   ;;  %v5451_v49 = vld [vmem:[%s5352_s21 + $0x3c] sm:$0xff]   ;;  %s5132_s19 = smov [#allocation8]  }
  0x81   : > { %6287 = vst [vmem:[#allocation12_spill] sm:$0xff] %v5403_v56  ;;  %4250 = vmatprep.mubr.bf16.mxu0 %v5403_v56  ;;  %v1208_v12 = vsel %vm5388_vm5, %v1203_v3, %v1207_v50  ;;  %v1241_v16 = vrot.slane %v1239_v6, 5  ;;  %v1246_v33 = vrot.slane %v1244_v25, 4  ;;  %v1105_v50 = vld [vmem:[%s5352_s21 + $0x3c] sm:$0xf]  ;;  %v6240_v3 = vrot.slane %v5381_v36, 5  ;;  %p5042_p10 = pneg %p5041_p1 }
  0x82   : > { %4051 = vmatpush3.bf16.msra.mxu1 %v4844_v8  ;;  %v1222_v8 = vrot.slane %v1220_v63, 4  ;;  %v1218_v13 = vsel %vm5388_vm5, %v1213_v4, %v1217_v55  ;;  %v1249_v34 = vrot.slane %v1247_v26, 5  ;;  %v1255_v35 = vrot.slane %v1253_v27, 5  ;;  %v5455_v51 = vld [vmem:[%s5352_s21 + $0x40] sm:$0xf]  ;;  %v4861_v63 = vld [vmem:[#allocation5 + $0x1d8] sm:$0xff]  }
  0x83   : > { %4243 = vmatpush3.bf16.msra.mxu0 %v4845_v9  ;;  %4052 = vmatprep.subr.bf16.mxu1 %v4846_v10  ;;  %v1225_v9 = vrot.slane %v1223_v0, 5  ;;  %v5426_v18 = vcombine.low %v1208_v12, %v1218_v13  ;;  %v5458_v52 = vld [vmem:[%s5352_s21 + $0x44] sm:$0x1]  ;;  %v1268_v53 = vshrl.u32 %v1105_v50, 16  ;;  %v1277_v58 = vshll.u32 %v5455_v51, 16  ;;  %v5483_v26 = vld [vmem:[%s5352_s21 + $0x48] sm:$0xff]  }
  0x84   : > { %4244 = vmatprep.subr.bf16.mxu0 %v4847_v11  ;;  %v1250_v45 = vor.u32 %v1249_v34, %v1246_v33  ;;  %v1281_v59 = vshrl.u32 %v5455_v51, 16  ;;  %v4864_v12 = vld [vmem:[#allocation5 + $0x10] sm:$0xff]   ;;  %v1126_v22 = vld [vmem:[%s5352_s21 + $0x90] sm:$0xf]  ;;  %v4892_v56 = vld [vmem:[#allocation5 + $0xa8] sm:$0xff]   ;;  %s5043_s4 = sshll.u32 %s5132_s19, 4  ;;  %s5044_s4 = int_to_ptr.vmem [resolvable:$false] %s5043_s4 }
  0x85   : > { %6288 = vst [vmem:[#allocation13_spill] sm:$0xff] %v5426_v18  ;;  %v1226_v19 = vor.u32 %v1225_v9, %v1222_v8  ;;  %v1270_v0 = vrot.slane %v1268_v53, 4  ;;  %v1279_v6 = vrot.slane %v1277_v58, 5  ;;  %v1108_v13 = vld [vmem:[%s5352_s21 + $0x48] sm:$0xf]  ;;  %s5045_s9 = scalar_lea.vmem %s5044_s4, 8192  ;;  %p5046_p3 = scmp.lt.s32.totalorder %s6175_s11, %s5044_s4 }
  0x86   : > { %4053 = vmatpush3.bf16.msra.mxu1 %v4846_v10  ;;  %v1231_v10 = vrot.slane %v1229_v1, 5  ;;  %v1251_v55 = vrot.slane %v1250_v45, 4  ;;  %v1283_v8 = vrot.slane %v1281_v59, 4  ;;  %v1112_v53 = vld [vmem:[%s5352_s21 + $0x58] sm:$0xf]  ;;  %p5047_p5 = scmp.lt.s32.totalorder %s5045_s9, %s5039_s10 }
  0x87   : > { %4245 = vmatpush3.bf16.msra.mxu0 %v4847_v11  ;;  %4054 = vmatprep.subr.bf16.mxu1 %v4848_v20  ;;  %v1235_v11 = vrot.slane %v1233_v2, 4  ;;  %v1227_v29 = vrot.slane %v1226_v19, 4  ;;  %v1287_v2 = vshll.u32 %v5458_v52, 16  ;;  %v1292_v19 = vshrl.u32 %v1108_v13, 16 }
  0x88   : > { %4246 = vmatprep.subr.bf16.mxu0 %v4849_v28  ;;  %v1256_v4 = vsel %vm5388_vm5, %v1251_v55, %v1255_v35  ;;  %v1325_v59 = vshll.u32 %v1112_v53, 16  ;;  %p5048_p9 = por %p5047_p5, %p5046_p3 }
  0x89   : > { %v1232_v40 = vsel %vm5388_vm5, %v1227_v29, %v1231_v10 }
  0x8a   : > { %4055 = vmatpush3.bf16.msra.mxu1 %v4848_v20  ;;  %v1236_v20 = vor.u32 %v1235_v11, %v1231_v10  ;;  %v1289_v11 = vrot.slane %v1287_v2, 5  ;;  %v1329_v2 = vshrl.u32 %v1112_v53, 16  ;;  %p5049_p2 = pnand %p5048_p9, %p5042_p10 }
  0x8b   : > { %4247 = vmatpush3.bf16.msra.mxu0 %v4849_v28  ;;  %4056 = vmatprep.subr.bf16.mxu1 %v4850_v32  ;;  %v1257_v28 = vshrl.u32 %v5430_v23, 16 }
  0x8c   : > { %4248 = vmatprep.subr.bf16.mxu0 %v4851_v43  ;;  %v1237_v30 = vrot.slane %v1236_v20, 4  ;;  %v1295_v20 = vshll.u32 %v1108_v13, 16 }
  0x8d   : > { %v1259_v39 = vrot.slane %v1257_v28, 4 }
  0x8e   : > { %4057 = vmatpush3.bf16.msra.mxu1 %v4850_v32  ;;  %v1263_v32 = vshll.u32 %v5433_v24, 16  ;;  %v1242_v41 = vsel %vm5388_vm5, %v1237_v30, %v1241_v16  ;;  %v1284_v16 = vor.u32 %v1283_v8, %v1279_v6  ;;  %v1294_v30 = vrot.slane %v1292_v19, 4  ;;  %v1114_v19 = vld [vmem:[%s5352_s21 + $0x60] sm:$0xf] }
  0x8f   : > { %4249 = vmatpush3.bf16.msra.mxu0 %v4851_v43  ;;  %4090 = vmatprep.subr.bf16.mxu1 %v4854_v54  ;;  %v4860_v43 = vld [vmem:[#allocation5 + $0x1d0] sm:$0xff]   ;;  %v5448_v44 = vcombine.low %v1232_v40, %v1242_v41  ;;  %v1260_v46 = vor.u32 %v1259_v39, %v1255_v35  ;;  %v4865_v39 = vld [vmem:[#allocation5 + $0x1e0] sm:$0xff]   ;;  %v1327_v8 = vrot.slane %v1325_v59, 5 }
  0x90   : > { %4282 = vmatprep.subr.bf16.mxu0 %v4855_v5  ;;  %v1265_v48 = vrot.slane %v1263_v32, 5  ;;  %v1285_v29 = vrot.slane %v1284_v16, 4  ;;  %v1297_v32 = vrot.slane %v1295_v20, 5  ;;  %v5507_v16 = vld [vmem:[%s5352_s21 + $0x60] sm:$0xff]  }
  0x91   : > { %4059 = vmatmul.mubr.bf16.vlgmr.msra.gmra.mrb[0].mxu1 %v5410_v61  ;;  %6289 = vst [vmem:[#allocation14_spill] sm:$0xff] %v5448_v44  ;;  %v1261_v57 = vrot.slane %v1260_v46, 4 }
  0x92   : > { %4251 = vmatmul.mubr.bf16.vlgmr.msra.gmra.mrb[0].mxu0 %v5426_v18  ;;  %4091 = vmatpush3.bf16.msra.mxu1 %v4854_v54  ;;  %v1271_v54 = vshll.u32 %v1105_v50, 16  ;;  %v1290_v40 = vsel %vm5388_vm5, %v1285_v29, %v1289_v11  ;;  %v1298_v41 = vor.u32 %v1297_v32, %v1294_v30  ;;  %v1111_v50 = vld [vmem:[%s5352_s21 + $0x54] sm:$0xf]  ;;  %v1343_v29 = vshll.u32 %v1114_v19, 16 }
  0x93   : > { %4283 = vmatpush3.bf16.msra.mxu0 %v4855_v5  ;;  %4062 = vmatprep.mubr.bf16.mxu1 %v5420_v7  ;;  %v1266_v5 = vsel %vm5388_vm5, %v1261_v57, %v1265_v48  ;;  %v1316_v57 = vshrl.u32 %v1111_v50, 16  ;;  %v1319_v58 = vshll.u32 %v1111_v50, 16 }
  0x94   : > { %4284 = vmatprep.subr.bf16.mxu0 %v4856_v15  ;;  %4092 = vmatprep.subr.bf16.mxu1 %v4859_v17  ;;  %v1273_v1 = vrot.slane %v1271_v54, 5  ;;  %v5470_v9 = vcombine.low %v1256_v4, %v1266_v5  ;;  %v1113_v54 = vld [vmem:[%s5352_s21 + $0x5c] sm:$0x1]  ;;  %v1299_v55 = vrot.slane %v1298_v41, 4 }
  0x95   : > { %4254 = vmatprep.mubr.bf16.mxu0 %v5448_v44  ;;  %v1335_v4 = vshll.u32 %v1113_v54, 16 }
  0x96   : > { %4093 = vmatpush3.bf16.msra.mxu1 %v4859_v17  ;;  %6290 = vst [vmem:[#allocation15_spill] sm:$0xff] %v5470_v9  ;;  %v1274_v10 = vor.u32 %v1273_v1, %v1270_v0  ;;  %v5478_v17 = vld [vmem:[%s5352_s21 + $0x50] sm:$0x1]  ;;  %v4866_v1 = vld [vmem:[#allocation5 + $0x1e8] sm:$0xff]  }
  0x97   : > { %4285 = vmatpush3.bf16.msra.mxu0 %v4856_v15  ;;  %v5474_v15 = vld [vmem:[%s5352_s21 + $0x4c] sm:$0xf]  ;;  %4094 = vmatprep.subr.bf16.mxu1 %v4864_v12  ;;  %v1311_v28 = vshll.u32 %v5478_v17, 16  ;;  %v1337_v13 = vrot.slane %v1335_v4, 5  ;;  %v2513_v4 = vrot.slane %v5384_v37, 5  ;;  %v6239_v37 = vrot.slane %v5407_v60, 5 }
  0x98   : > { %4286 = vmatprep.subr.bf16.mxu0 %v4860_v43  ;;  %v1301_v21 = vshll.u32 %v5474_v15, 16  ;;  %v1275_v25 = vrot.slane %v1274_v10, 4  ;;  %v1305_v27 = vshrl.u32 %v5474_v15, 16  ;;  %v4869_v10 = vld [vmem:[#allocation5 + $0x18] sm:$0xff]  }
  0x99   : > { %4063 = vmatmul.mubr.bf16.gmra.mrb[4].mxu1 %v5446_v42  ;;  %v1313_v45 = vrot.slane %v1311_v28, 5  ;;  %v1340_v28 = vshrl.u32 %v1114_v19, 16  ;;  %v2520_v19 = vrot.slane %v5413_v62, 5  ;;  %v2527_v62 = vrot.slane %v5433_v24, 5 }
  0x9a   : > { %4066 = vmatprep.mubr.bf16.mxu1 %v5451_v49  ;;  %4255 = vmatmul.mubr.bf16.gmra.mrb[4].mxu0 %v5470_v9  ;;  %v1303_v33 = vrot.slane %v1301_v21, 5  ;;  %v1280_v34 = vsel %vm5388_vm5, %v1275_v25, %v1279_v6  ;;  %v1307_v35 = vrot.slane %v1305_v27, 4  ;;  %v1321_v6 = vrot.slane %v1319_v58, 5  ;;  %v1115_v25 = vld [vmem:[%s5352_s21 + $0x64] sm:$0xf] }
  0x9b   : > { %4287 = vmatpush3.bf16.msra.mxu0 %v4860_v43  ;;  %4095 = vmatpush3.bf16.msra.mxu1 %v4864_v12  ;;  %v5492_v43 = vld [vmem:[%s5352_s21 + $0x54] sm:$0xff]   ;;  %v5494_v46 = vcombine.low %v1280_v34, %v1290_v40  ;;  %v1331_v12 = vrot.slane %v1329_v2, 4  ;;  %v1116_v27 = vld [vmem:[%s5352_s21 + $0x68] sm:$0x1]  ;;  %v1349_v32 = vshll.u32 %v1115_v25, 16  ;;  %v1342_v41 = vrot.slane %v1340_v28, 4 }
  0x9c   : > { %4288 = vmatprep.subr.bf16.mxu0 %v4861_v63  ;;  %v1308_v48 = vor.u32 %v1307_v35, %v1303_v33  ;;  %v1304_v5 = vsel %vm5388_vm5, %v1299_v55, %v1303_v33  ;;  %4096 = vmatprep.subr.bf16.mxu1 %v4869_v10  ;;  %v1353_v33 = vshrl.u32 %v1115_v25, 16  ;;  %v1359_v34 = vshll.u32 %v1116_v27, 16  ;;  %v4870_v35 = vld [vmem:[#allocation5 + $0x1f0] sm:$0xff]   ;;  %v4871_v55 = vld [vmem:[#allocation5 + $0x1f8] sm:$0xff]   ;;  %v4878_v28 = vld [vmem:[#allocation5 + $0x28] sm:$0xff]  }
  0x9d   : > { %6291 = vst [vmem:[#allocation16_spill] sm:$0xff] %v5494_v46  ;;  %4258 = vmatprep.mubr.bf16.mxu0 %v5494_v46  ;;  %v1332_v30 = vor.u32 %v1331_v12, %v1327_v8  ;;  %v1351_v50 = vrot.slane %v1349_v32, 5  ;;  %v5523_v2 = vld [vmem:[%s5352_s21 + $0x6c] sm:$0xff]   ;;  %v5546_v25 = vld [vmem:[%s5352_s21 + $0x84] sm:$0xff]   ;;  %v2519_v27 = vrot.slane %v6239_v37, 4 }
  0x9e   : > { %v1309_v0 = vrot.slane %v1308_v48, 4  ;;  %v1355_v53 = vrot.slane %v1353_v33, 4  ;;  %v1361_v54 = vrot.slane %v1359_v34, 5  ;;  %6293 = vst [vmem:[#allocation18_spill] sm:$0xff] %v5523_v2  ;;  %6297 = vst [vmem:[#allocation22_spill] sm:$0xff] %v5546_v25  ;;  %v6237_v33 = vrot.slane %v5455_v51, 5 }
  0x9f   : > { %4289 = vmatpush3.bf16.msra.mxu0 %v4861_v63  ;;  %v1318_v63 = vrot.slane %v1316_v57, 4  ;;  %4097 = vmatpush3.bf16.msra.mxu1 %v4869_v10  ;;  %v1333_v48 = vrot.slane %v1332_v30, 4  ;;  %v5554_v30 = vsel %vm5375_vm4, %v2519_v27, %v2520_v19  ;;  %v4882_v34 = vld [vmem:[#allocation5 + $0x30] sm:$0xff]   ;;  %v1120_v27 = vld [vmem:[%s5352_s21 + $0x78] sm:$0xf] }
  0xa0   : > { %4290 = vmatprep.subr.bf16.mxu0 %v4865_v39  ;;  %v1314_v11 = vsel %vm5388_vm5, %v1309_v0, %v1313_v45  ;;  %v1345_v45 = vrot.slane %v1343_v29, 5  ;;  %v1356_v0 = vor.u32 %v1355_v53, %v1351_v50  ;;  %v6238_v29 = vrot.slane %v5430_v23, 5 }
  0xa1   : > { %4067 = vmatmul.mubr.bf16.gmra.mrb[8].mxu1 %v5483_v26  ;;  %v5510_v20 = vcombine.low %v1304_v5, %v1314_v11  ;;  %v1322_v21 = vor.u32 %v1321_v6, %v1318_v63  ;;  %v1338_v59 = vsel %vm5388_vm5, %v1333_v48, %v1337_v13  ;;  %v4874_v6 = vld [vmem:[#allocation5 + $0x20] sm:$0xff]   ;;  %v2541_v53 = vrot.slane %v5478_v17, 5 }
  0xa2   : > { %4070 = vmatprep.mubr.bf16.mxu1 %v5492_v43  ;;  %v1346_v58 = vor.u32 %v1345_v45, %v1342_v41  ;;  %v5537_v11 = vld [vmem:[%s5352_s21 + $0x78] sm:$0xff]   ;;  %4098 = vmatprep.subr.bf16.mxu1 %v4874_v6  ;;  %v2526_v32 = vrot.slane %v6238_v29, 4  ;;  %v2533_v41 = vrot.slane %v6237_v33, 4  ;;  %v1123_v29 = vld [vmem:[%s5352_s21 + $0x84] sm:$0xf] }
  0xa3   : > { %6292 = vst [vmem:[#allocation17_spill] sm:$0xff] %v5510_v20  ;;  %4291 = vmatpush3.bf16.msra.mxu0 %v4865_v39  ;;  %v1323_v40 = vrot.slane %v1322_v21, 4  ;;  %v2512_v39 = vrot.slane %v6240_v3, 4  ;;  %6295 = vst [vmem:[#allocation20_spill] sm:$0xff] %v5537_v11  ;;  %v4875_v13 = vld [vmem:[#allocation5 + $0x80] sm:$0xff]   ;;  %4099 = vmatpush3.bf16.msra.mxu1 %v4874_v6  ;;  %v4879_v45 = vld [vmem:[#allocation5 + $0x88] sm:$0xff]  }
  0xa4   : > { %4292 = vmatprep.subr.bf16.mxu0 %v4866_v1  ;;  %4259 = vmatmul.mubr.bf16.gmra.mrb[8].mxu0 %v5510_v20  ;;  %v1347_v63 = vrot.slane %v1346_v58, 4  ;;  %v5565_v24 = vsel %vm5375_vm4, %v2526_v32, %v2527_v62  ;;  %v5575_v48 = vld [vmem:[%s5352_s21 + $0x9c] sm:$0xff]   ;;  %v5590_v58 = vld [vmem:[%s5352_s21 + $0x74] sm:$0x1] }
  0xa5   : > { %v1328_v57 = vsel %vm5388_vm5, %v1323_v40, %v1327_v8  ;;  %v5531_v8 = vsel %vm5375_vm4, %v2512_v39, %v2513_v4  ;;  %4100 = vmatprep.subr.bf16.mxu1 %v4878_v28  ;;  %v5569_v40 = vld [vmem:[%s5352_s21 + $0x90] sm:$0xff]   ;;  %v6236_v39 = vrot.slane %v5474_v15, 5  ;;  %6299 = vst [vmem:[#allocation24_spill] sm:$0xff] %v5575_v48 }
  0xa6   : > { %v5526_v5 = vcombine.low %v1328_v57, %v1338_v59  ;;  %v1352_v10 = vsel %vm5388_vm5, %v1347_v63, %v1351_v50  ;;  %6298 = vst [vmem:[#allocation23_spill] sm:$0xff] %v5569_v40  ;;  %v4883_v63 = vld [vmem:[#allocation5 + $0x90] sm:$0xff]  }
  0xa7   : > { %4293 = vmatpush3.bf16.msra.mxu0 %v4866_v1  ;;  %v1357_v1 = vrot.slane %v1356_v0, 4  ;;  %4101 = vmatpush3.bf16.msra.mxu1 %v4878_v28  ;;  %v2540_v57 = vrot.slane %v6236_v39, 4  ;;  %v5606_v28 = vld [vmem:[%s5352_s21 + $0xa8] sm:$0xff]  }
  0xa8   : > { %4294 = vmatprep.subr.bf16.mxu0 %v4870_v35  ;;  %6294 = vst [vmem:[#allocation19_spill] sm:$0xff] %v5526_v5  ;;  %4262 = vmatprep.mubr.bf16.mxu0 %v5526_v5  ;;  %6300 = vst [vmem:[#allocation25_spill] sm:$0xff] %v5606_v28 }
  0xa9   : > { %4071 = vmatmul.mubr.bf16.gmra.mrb[12].mxu1 %v5507_v16  ;;  %v1362_v12 = vsel %vm5388_vm5, %v1357_v1, %v1361_v54  ;;  %4102 = vmatprep.subr.bf16.mxu1 %v4882_v34  ;;  %v1117_v54 = vld [vmem:[%s5352_s21 + $0x6c] sm:$0xf]  ;;  %v1383_v1 = vshll.u32 %v5590_v58, 16  ;;  %v5598_v6 = vsel %vm5375_vm4, %v2540_v57, %v2541_v53  ;;  %v1388_v53 = vshrl.u32 %v1120_v27, 16  ;;  %v5616_v57 = vld [vmem:[%s5352_s21 + $0xb4] sm:$0xff]  }
  0xaa   : > { %4074 = vmatprep.mubr.bf16.mxu1 %v5523_v2  ;;  %v5543_v21 = vcombine.low %v1352_v10, %v1362_v12  ;;  %v1364_v59 = vshrl.u32 %v1117_v54, 16  ;;  %v1367_v0 = vshll.u32 %v1117_v54, 16  ;;  %v1391_v54 = vshll.u32 %v1120_v27, 16  ;;  %6301 = vst [vmem:[#allocation26_spill] sm:$0xff] %v5616_v57 }
  0xab   : > { %4295 = vmatpush3.bf16.msra.mxu0 %v4870_v35  ;;  %v2534_v35 = vrot.slane %v5458_v52, 5  ;;  %v4886_v52 = vld [vmem:[#allocation5 + $0x38] sm:$0xff]   ;;  %4103 = vmatpush3.bf16.msra.mxu1 %v4882_v34 }
  0xac   : > { %4296 = vmatprep.subr.bf16.mxu0 %v4871_v55  ;;  %6296 = vst [vmem:[#allocation21_spill] sm:$0xff] %v5543_v21  ;;  %4263 = vmatmul.mubr.bf16.gmra.mrb[12].mxu0 %v5543_v21  ;;  %v1366_v10 = vrot.slane %v1364_v59, 4  ;;  %v1369_v12 = vrot.slane %v1367_v0, 5  ;;  %v4887_v34 = vld [vmem:[#allocation5 + $0x98] sm:$0xff]  }
  0xad   : > { %4298 = vmatprep.mubr.bf16.mxu0 %v5426_v18  ;;  %v5579_v50 = vsel %vm5375_vm4, %v2533_v41, %v2534_v35  ;;  %4104 = vmatprep.subr.bf16.mxu1 %v4886_v52  ;;  %v5610_v35 = vld [vmem:[%s5352_s21 + $0x7c] sm:$0xf]  ;;  %v5613_v41 = vld [vmem:[%s5352_s21 + $0x80] sm:$0x1]  ;;  %v1439_v18 = vshll.u32 %v1126_v22, 16 }
  0xae   : > { %v1370_v62 = vor.u32 %v1369_v12, %v1366_v10  ;;  %v1397_v59 = vshll.u32 %v5610_v35, 16  ;;  %v1401_v0 = vshrl.u32 %v5610_v35, 16  ;;  %v5625_v10 = vrot.slane %v1383_v1, 5  ;;  %v5640_v1 = vld [vmem:[%s5352_s21 + $0x8c] sm:$0x1] }
  0xaf   : > { %4297 = vmatpush3.bf16.msra.mxu0 %v4871_v55  ;;  %v5584_v55 = vld [vmem:[%s5352_s21 + $0x70] sm:$0xf]  ;;  %4105 = vmatpush3.bf16.msra.mxu1 %v4886_v52  ;;  %v1390_v12 = vrot.slane %v1388_v53, 4  ;;  %v1412_v53 = vshrl.u32 %v1123_v29, 16  ;;  %v1431_v3 = vshll.u32 %v5640_v1, 16 }
  0xb0   : > { %4330 = vmatprep.subr.bf16.mxu0 %v4875_v13  ;;  %v1373_v4 = vshll.u32 %v5584_v55, 16  ;;  %v1377_v17 = vshrl.u32 %v5584_v55, 16  ;;  %v5623_v52 = vrot.slane %v1370_v62, 4  ;;  %v5629_v27 = vrot.slane %v1397_v59, 5  ;;  %v5637_v62 = vld [vmem:[%s5352_s21 + $0x88] sm:$0xf] }
  0xb1   : > { %4075 = vmatmul.mubr.bf16.gmra.mrb[16].mxu1 %v5537_v11  ;;  %v1403_v39 = vrot.slane %v1401_v0, 4  ;;  %v1415_v59 = vshll.u32 %v1123_v29, 16  ;;  %v1421_v0 = vshll.u32 %v5637_v62, 16  ;;  %v5653_v29 = vld [vmem:[%s5352_s21 + $0x94] sm:$0xf] }
  0xb2   : > { %4078 = vmatprep.mubr.bf16.mxu1 %v5546_v25  ;;  %v5601_v19 = vrot.slane %v1373_v4, 5  ;;  %v1407_v4 = vshll.u32 %v5613_v41, 16 }
  0xb4   : > { %4299 = vmatmul.mubr.bf16.vlgmr.msra.gmra.mrb[0].mxu0 %v5448_v44  ;;  %v5631_v33 = vrot.slane %v1407_v4, 5 }
  0xb5   : > { %4331 = vmatpush3.bf16.msra.mxu0 %v4875_v13  ;;  %4302 = vmatprep.mubr.bf16.mxu0 %v5470_v9  ;;  %v1379_v13 = vrot.slane %v1377_v17, 4  ;;  %v5621_v17 = vld [vmem:[#allocation5 + $0x180] sm:$0xff]   ;;  %v5656_v9 = vld [vmem:[%s5352_s21 + $0xc0] sm:$0xff]  }
  0xb6   : > { %4332 = vmatprep.subr.bf16.mxu0 %v4879_v45  ;;  %4138 = vmatprep.subr.bf16.mxu1 %v5621_v17  ;;  %6302 = vst [vmem:[#allocation27_spill] sm:$0xff] %v5656_v9 }
  0xb7   : > { %v1380_v32 = vor.u32 %v1379_v13, %v5601_v19 }
  0xb9   : > { %4079 = vmatmul.mubr.bf16.gmra.mrb[20].mxu1 %v5569_v40  ;;  %4333 = vmatpush3.bf16.msra.mxu0 %v4879_v45  ;;  %v1393_v45 = vrot.slane %v1391_v54, 5  ;;  %v5627_v13 = vrot.slane %v1380_v32, 4  ;;  %v4890_v54 = vld [vmem:[#allocation5 + $0xa0] sm:$0xff]   ;;  %v1404_v32 = vor.u32 %v1403_v39, %v5629_v27  ;;  %v5650_v39 = vrot.slane %v1421_v0, 5  ;;  %v5674_v40 = vld [vmem:[%s5352_s21 + $0xa0] sm:$0xf] }
  0xba   : > { %4082 = vmatprep.mubr.bf16.mxu1 %v5575_v48  ;;  %4334 = vmatprep.subr.bf16.mxu0 %v4883_v63  ;;  %v1129_v48 = vld [vmem:[%s5352_s21 + $0x9c] sm:$0xf]  ;;  %6303 = vst [vmem:[#allocation28_spill] sm:$0xff] %v5674_v40 }
  0xbb   : > { %v1394_v37 = vor.u32 %v1393_v45, %v1390_v12  ;;  %v1414_v12 = vrot.slane %v1412_v53, 4  ;;  %v1425_v45 = vshrl.u32 %v5637_v62, 16  ;;  %v5659_v53 = vld [vmem:[%s5352_s21 + $0x98] sm:$0x1] }
  0xbc   : > { %4303 = vmatmul.mubr.bf16.gmra.mrb[4].mxu0 %v5494_v46  ;;  %v1436_v46 = vshrl.u32 %v1126_v22, 16  ;;  %v1441_v22 = vrot.slane %v1439_v18, 5 }
  0xbd   : > { %4306 = vmatprep.mubr.bf16.mxu0 %v5510_v20  ;;  %4335 = vmatpush3.bf16.msra.mxu0 %v4883_v63  ;;  %v1395_v4 = vrot.slane %v1394_v37, 4  ;;  %v1405_v63 = vrot.slane %v1404_v32, 4  ;;  %v1417_v20 = vrot.slane %v1415_v59, 5  ;;  %v1427_v44 = vrot.slane %v1425_v45, 4 }
  0xbe   : > { %4336 = vmatprep.subr.bf16.mxu0 %v4887_v34  ;;  %v1433_v37 = vrot.slane %v1431_v3, 5  ;;  %v1376_v32 = vsel %vm5388_vm5, %v5623_v52, %v5601_v19  ;;  %v1438_v0 = vrot.slane %v1436_v46, 4  ;;  %v1386_v3 = vsel %vm5388_vm5, %v5627_v13, %v5625_v10  ;;  %v4888_v19 = vld [vmem:[%s5352_s21] sm:$0xff]  }
  0xbf   : > { %v1418_v59 = vor.u32 %v1417_v20, %v1414_v12  ;;  %v1428_v45 = vor.u32 %v1427_v44, %v5650_v39  ;;  %v1455_v46 = vshll.u32 %v5659_v53, 16  ;;  %v1460_v52 = vshrl.u32 %v1129_v48, 16 }
  0xc0   : > { %v1442_v44 = vor.u32 %v1441_v22, %v1438_v0  ;;  %v1463_v13 = vshll.u32 %v1129_v48, 16  ;;  %v1400_v12 = vsel %vm5388_vm5, %v1395_v4, %v5629_v27  ;;  %v5695_v0 = vld [vmem:[%s5352_s21 + $0xa4] sm:$0x1]  ;;  %v1132_v4 = vld [vmem:[%s5352_s21 + $0xa8] sm:$0xf] }
  0xc1   : > { %4083 = vmatmul.mubr.bf16.gmra.mrb[24].mxu1 %v5606_v28  ;;  %4337 = vmatpush3.bf16.msra.mxu0 %v4887_v34  ;;  %v1449_v28 = vshrl.u32 %v5653_v29, 16  ;;  %v1419_v34 = vrot.slane %v1418_v59, 4  ;;  %v1429_v10 = vrot.slane %v1428_v45, 4  ;;  %v1462_v59 = vrot.slane %v1460_v52, 4  ;;  %v5699_v22 = vld [vmem:[%s5352_s21 + $0xac] sm:$0xf] }
  0xc2   : > { %4086 = vmatprep.mubr.bf16.mxu1 %v5616_v57  ;;  %v1445_v57 = vshll.u32 %v5653_v29, 16  ;;  %4338 = vmatprep.subr.bf16.mxu0 %v4890_v54  ;;  %v1469_v45 = vshll.u32 %v5674_v40, 16  ;;  %v1465_v27 = vrot.slane %v1463_v13, 5  ;;  %v1497_v2 = vshrl.u32 %v5699_v22, 16 }
  0xc3   : > { %v1451_v18 = vrot.slane %v1449_v28, 4  ;;  %v1424_v48 = vsel %vm5388_vm5, %v1419_v34, %v5650_v39  ;;  %v1473_v39 = vshrl.u32 %v5674_v40, 16  ;;  %v5707_v34 = vld [vmem:[%s5352_s21 + $0xb0] sm:$0x1]  ;;  %v5719_v40 = vld [vmem:[%s5352_s21 + $0xb8] sm:$0xf] }
  0xc4   : > { %v5677_v20 = vrot.slane %v1445_v57, 5  ;;  %4307 = vmatmul.mubr.bf16.gmra.mrb[8].mxu0 %v5526_v5  ;;  %v1410_v57 = vsel %vm5388_vm5, %v1405_v63, %v5631_v33  ;;  %v4894_v33 = vld [vmem:[#allocation5 + $0xb0] sm:$0xff]   ;;  %v1457_v63 = vrot.slane %v1455_v46, 5  ;;  %v5703_v52 = vrot.slane %v1469_v45, 5  ;;  %v1135_v46 = vld [vmem:[%s5352_s21 + $0xb4] sm:$0xf] }
  0xc5   : > { %4310 = vmatprep.mubr.bf16.mxu0 %v5543_v21  ;;  %4339 = vmatpush3.bf16.msra.mxu0 %v4890_v54  ;;  %v1434_v54 = vsel %vm5388_vm5, %v1429_v10, %v1433_v37  ;;  %v5711_v13 = vcombine.low %v1400_v12, %v1410_v57  ;;  %v1443_v21 = vrot.slane %v1442_v44, 4  ;;  %v1484_v5 = vshrl.u32 %v1132_v4, 16  ;;  %6307 = vst [vmem:[#allocation32_spill] sm:$0xff] %v5719_v40  ;;  %v4891_v57 = vld [vmem:[#allocation5 + $0x188] sm:$0xff]  }
  0xc6   : > { %v1452_v28 = vor.u32 %v1451_v18, %v5677_v20  ;;  %4340 = vmatprep.subr.bf16.mxu0 %v4892_v56  ;;  %v5709_v18 = vcombine.low %v1376_v32, %v1386_v3  ;;  %v1475_v25 = vrot.slane %v1473_v39, 4  ;;  %v1493_v37 = vshll.u32 %v5699_v22, 16  ;;  %v4896_v32 = vld [vmem:[#allocation5 + $0xb8] sm:$0xff]  }
  0xc7   : > { %6305 = vst [vmem:[#allocation30_spill] sm:$0xff] %v5711_v13  ;;  %v5715_v10 = vcombine.low %v1424_v48, %v1434_v54  ;;  %v1466_v45 = vor.u32 %v1465_v27, %v1462_v59  ;;  %v1486_v11 = vrot.slane %v1484_v5, 4  ;;  %v1479_v44 = vshll.u32 %v5695_v0, 16 }
  0xc8   : > { %6304 = vst [vmem:[#allocation29_spill] sm:$0xff] %v5709_v18  ;;  %v1476_v3 = vor.u32 %v1475_v25, %v5703_v52  ;;  %v5723_v12 = vrot.slane %v1493_v37, 5  ;;  %v1448_v5 = vsel %vm5388_vm5, %v1443_v21, %v5677_v20  ;;  %v1499_v59 = vrot.slane %v1497_v2, 4  ;;  %v4926_v21 = vld [vmem:[%s5352_s21 + $0xc] sm:$0xff]  }
  0xc9   : > { %4087 = vmatmul.mubr.bf16.gmra.mrb[28].mxu1 %v5656_v9  ;;  %v1453_v9 = vrot.slane %v1452_v28, 4  ;;  %4341 = vmatpush3.bf16.msra.mxu0 %v4892_v56  ;;  %6306 = vst [vmem:[#allocation31_spill] sm:$0xff] %v5715_v10  ;;  %v1503_v48 = vshll.u32 %v5707_v34, 16  ;;  %v1508_v28 = vshrl.u32 %v1135_v46, 16  ;;  %v1511_v54 = vshll.u32 %v1135_v46, 16 }
  0xca   : > { %4106 = vmatprep.mubr.bf16.mxu1 %v4888_v19  ;;  %v1487_v19 = vshll.u32 %v1132_v4, 16  ;;  %4342 = vmatprep.subr.bf16.mxu0 %v4894_v33  ;;  %v5734_v4 = vld [vmem:[%s5352_s21 + $0xbc] sm:$0x1]  ;;  %v1517_v39 = vshll.u32 %v5719_v40, 16  ;;  %v1467_v2 = vrot.slane %v1466_v45, 4  ;;  %v1500_v20 = vor.u32 %v1499_v59, %v5723_v12  ;;  %v4893_v59 = vld [vmem:[#allocation5 + $0x190] sm:$0xff]  }
  0xcb   : > { %v1458_v25 = vsel %vm5388_vm5, %v1453_v9, %v1457_v63  ;;  %v1521_v37 = vshrl.u32 %v5719_v40, 16  ;;  %v1477_v9 = vrot.slane %v1476_v3, 4  ;;  %v5748_v46 = vld [vmem:[%s5352_s21 + $0xc4] sm:$0xf] }
  0xcc   : > { %v1489_v56 = vrot.slane %v1487_v19, 5  ;;  %4311 = vmatmul.mubr.bf16.gmra.mrb[12].mxu0 %v5709_v18  ;;  %v1510_v19 = vrot.slane %v1508_v28, 4  ;;  %v5741_v18 = vld [vmem:[#allocation5 + $0x140] sm:$0xff]   ;;  %v5745_v63 = vrot.slane %v1517_v39, 5  ;;  %6309 = vst [vmem:[#allocation34_spill] sm:$0xff] %v5748_v46  ;;  %v5750_v45 = vcombine.low %v1448_v5, %v1458_v25 }
  0xcd   : > { %4314 = vmatprep.mubr.bf16.mxu0 %v5711_v13  ;;  %4343 = vmatpush3.bf16.msra.mxu0 %v4894_v33  ;;  %v1138_v13 = vld [vmem:[%s5352_s21 + $0xc0] sm:$0xf]  ;;  %6308 = vst [vmem:[#allocation33_spill] sm:$0xff] %v5741_v18  ;;  %v1513_v33 = vrot.slane %v1511_v54, 5  ;;  %v1523_v28 = vrot.slane %v1521_v37, 4  ;;  %v1501_v54 = vrot.slane %v1500_v20, 4 }
  0xce   : > { %v1490_v27 = vor.u32 %v1489_v56, %v1486_v11  ;;  %4344 = vmatprep.subr.bf16.mxu0 %v4896_v32  ;;  %v1481_v11 = vrot.slane %v1479_v44, 5  ;;  %6310 = vst [vmem:[#allocation35_spill] sm:$0xff] %v5750_v45  ;;  %v1505_v56 = vrot.slane %v1503_v48, 5  ;;  %v1857_v3 = vshll.u32 %v1138_v13, 16  ;;  %v5757_v5 = vld [vmem:[%s5352_s21 + $0xc8] sm:$0x1] }
  0xcf   : > { %v1514_v40 = vor.u32 %v1513_v33, %v1510_v19  ;;  %v1472_v44 = vsel %vm5388_vm5, %v1467_v2, %v5703_v52  ;;  %6311 = vst [vmem:[#allocation36_spill] sm:$0xff] %v5757_v5  ;;  %v1863_v25 = vshll.u32 %v5748_v46, 16  ;;  %v4895_v48 = vld [vmem:[#allocation5 + $0x198] sm:$0xff]  }
  0xd0   : > { %v1141_v39 = vld [vmem:[%s5352_s21 + $0xcc] sm:$0xf]  ;;  %v1859_v19 = vrot.slane %v1857_v3, 5  ;;  %v5766_v37 = vld [vmem:[%s5352_s21 + $0xd0] sm:$0xf] }
  0xd1   : > { %4107 = vmatmul.mubr.bf16.vlgmr.msra.gmra.mrb[0].mxu1 %v4926_v21  ;;  %v1527_v21 = vshll.u32 %v5734_v4, 16  ;;  %4345 = vmatpush3.bf16.msra.mxu0 %v4896_v32  ;;  %6312 = vst [vmem:[#allocation37_spill] sm:$0xff] %v5766_v37  ;;  %v5769_v52 = vrot.slane %v1514_v40, 4  ;;  %v5773_v20 = vrot.slane %v1863_v25, 5  ;;  %v5779_v33 = vld [vmem:[%s5352_s21 + $0xd4] sm:$0x1] }
  0xd2   : > { %4139 = vmatpush3.bf16.msra.mxu1 %v5621_v17  ;;  %4110 = vmatprep.mubr.bf16.mxu1 %v5410_v61  ;;  %v1491_v17 = vrot.slane %v1490_v27, 4  ;;  %v1854_v61 = vshrl.u32 %v1138_v13, 16  ;;  %v1482_v27 = vsel %vm5388_vm5, %v1477_v9, %v1481_v11  ;;  %v1524_v13 = vor.u32 %v1523_v28, %v5745_v63  ;;  %6313 = vst [vmem:[#allocation38_spill] sm:$0xff] %v5779_v33 }
  0xd3   : > { %4140 = vmatprep.subr.bf16.mxu1 %v4891_v57  ;;  %4378 = vmatprep.subr.bf16.mxu0 %v5741_v18  ;;  %v5771_v2 = vrot.slane %v1527_v21, 5  ;;  %v1867_v9 = vshrl.u32 %v5748_v46, 16  ;;  %v1873_v11 = vshll.u32 %v5757_v5, 16  ;;  %v2140_v28 = vshrl.u32 %v1141_v39, 16  ;;  %v4899_v18 = vld [vmem:[#allocation5 + $0x1a8] sm:$0xff]  }
  0xd4   : > { %v1856_v32 = vrot.slane %v1854_v61, 4  ;;  %4315 = vmatmul.mubr.bf16.gmra.mrb[16].mxu0 %v5715_v10  ;;  %v2143_v61 = vshll.u32 %v1141_v39, 16  ;;  %v1496_v40 = vsel %vm5388_vm5, %v1491_v17, %v5723_v12  ;;  %v1506_v21 = vsel %vm5388_vm5, %v1501_v54, %v1505_v56  ;;  %v5798_v10 = vld [vmem:[%s5352_s21] sm:$0xe] }
  0xd5   : > { %4318 = vmatprep.mubr.bf16.mxu0 %v5750_v45  ;;  %v1869_v3 = vrot.slane %v1867_v9, 4  ;;  %v2149_v25 = vshll.u32 %v5766_v37, 16  ;;  %v5794_v45 = vcombine.low %v1472_v44, %v1482_v27  ;;  %v2153_v17 = vshrl.u32 %v5766_v37, 16  ;;  %v4897_v9 = vld [vmem:[#allocation5 + $0x1a0] sm:$0xff]  }
  0xd6   : > { %4141 = vmatpush3.bf16.msra.mxu1 %v4891_v57  ;;  %v1860_v57 = vor.u32 %v1859_v19, %v1856_v32  ;;  %v5789_v32 = vld [vmem:[%s5352_s21 + $0x4] sm:$0xf]  ;;  %v5792_v19 = vld [vmem:[%s5352_s21 + $0x8] sm:$0x1]  ;;  %v2145_v39 = vrot.slane %v2143_v61, 5  ;;  %v2159_v54 = vshll.u32 %v5779_v33, 16  ;;  %v5805_v44 = vcombine.low %v1496_v40, %v1506_v21 }
  0xd7   : > { %4142 = vmatprep.subr.bf16.mxu1 %v4893_v59  ;;  %v1870_v12 = vor.u32 %v1869_v3, %v5773_v20  ;;  %v5801_v56 = vrot.slane %v2149_v25, 5  ;;  %v1525_v27 = vrot.slane %v1524_v13, 4  ;;  %v1875_v5 = vrot.slane %v1873_v11, 5  ;;  %v2427_v21 = vld [vmem:[%s5352_s21 + $0x18] sm:$0xe] }
  0xd8   : > { %v2155_v46 = vrot.slane %v2153_v17, 4  ;;  %v2496_v3 = vrot.slane %v5789_v32, 5  ;;  %v5809_v25 = vrot.slane %v2159_v54, 5  ;;  %v3759_v33 = vrot.slane %v5798_v10, 9  ;;  %v4901_v54 = vld [vmem:[#allocation5 + $0x1b0] sm:$0xff]  }
  0xd9   : > { %4111 = vmatmul.mubr.bf16.gmra.mrb[4].mxu1 %v5420_v7  ;;  %v2142_v7 = vrot.slane %v2140_v28, 4  ;;  %v2426_v28 = vld [vmem:[%s5352_s21 + $0xc] sm:$0xe]  ;;  %v1871_v61 = vrot.slane %v1870_v12, 4  ;;  %v2499_v37 = vrot.slane %v5792_v19, 5  ;;  %v3761_v11 = vrot.slane %v2427_v21, 9 }
  0xda   : > { %4114 = vmatprep.mubr.bf16.mxu1 %v5446_v42  ;;  %4143 = vmatpush3.bf16.msra.mxu1 %v4893_v59  ;;  %v1861_v42 = vrot.slane %v1860_v57, 4  ;;  %v3760_v40 = vrot.slane %v2426_v28, 9  ;;  %v2156_v57 = vor.u32 %v2155_v46, %v5801_v56  ;;  %v1530_v10 = vsel %vm5388_vm5, %v1525_v27, %v5771_v2  ;;  %v2428_v12 = vld [vmem:[%s5352_s21 + $0x24] sm:$0xe] }
  0xdb   : > { %4144 = vmatprep.subr.bf16.mxu1 %v4895_v48  ;;  %v2146_v59 = vor.u32 %v2145_v39, %v2142_v7  ;;  %v6314_v46 = vrot.slane %v5365_v14, 5  ;;  %v6315_v2 = vrot.slane %v5381_v36, 5  ;;  %v2429_v14 = vld [vmem:[%s5352_s21 + $0x30] sm:$0xe]  ;;  %v3762_v27 = vrot.slane %v2428_v12, 9 }
  0xdc   : > { %4319 = vmatmul.mubr.bf16.gmra.mrb[20].mxu0 %v5794_v45  ;;  %v1866_v7 = vsel %vm5388_vm5, %v1861_v42, %v5773_v20  ;;  %v2430_v42 = vld [vmem:[%s5352_s21 + $0x3c] sm:$0xe] }
  0xdd   : > { %v2147_v13 = vrot.slane %v2146_v59, 4  ;;  %4322 = vmatprep.mubr.bf16.mxu0 %v5805_v44  ;;  %v2504_v39 = vsel %vm5375_vm4, %v3760_v40, %v6314_v46  ;;  %v2511_v20 = vsel %vm5375_vm4, %v3761_v11, %v6315_v2  ;;  %v3764_v36 = vrot.slane %v2430_v42, 9  ;;  %v5896_v12 = vld [vmem:[#allocation5 + $0x40] sm:$0xff]  }
  0xde   : > { %4145 = vmatpush3.bf16.msra.mxu1 %v4895_v48  ;;  %v1520_v48 = vsel %vm5388_vm5, %v5769_v52, %v5745_v63  ;;  %v1876_v63 = vsel %vm5388_vm5, %v1871_v61, %v1875_v5  ;;  %v2498_v52 = vrot.slane %v2496_v3, 4  ;;  %v5836_v17 = vcombine.low %v2504_v39, %v5397_v47 }
  0xdf   : > { %4146 = vmatprep.subr.bf16.mxu1 %v4897_v9  ;;  %v3763_v5 = vrot.slane %v2429_v14, 9  ;;  %v5848_v59 = vcombine.low %v1520_v48, %v1530_v10  ;;  %v2157_v47 = vrot.slane %v2156_v57, 4  ;;  %v5850_v28 = vcombine.low %v1866_v7, %v1876_v63  ;;  %v2434_v7 = vld [vmem:[%s5352_s21 + $0x6c] sm:$0xe] }
  0xe0   : > { %v6316_v61 = vrot.slane %v5407_v60, 5  ;;  %v6318_v11 = vrot.slane %v5455_v51, 5  ;;  %v6319_v10 = vrot.slane %v5474_v15, 5  ;;  %v2152_v51 = vsel %vm5388_vm5, %v2147_v13, %v5801_v56  ;;  %v2435_v13 = vld [vmem:[%s5352_s21 + $0x78] sm:$0xe] }
  0xe1   : > { %4115 = vmatmul.mubr.bf16.gmra.mrb[8].mxu1 %v5451_v49  ;;  %v5845_v49 = vcombine.low %v2511_v20, %v5531_v8  ;;  %v2559_v15 = vrot.slane %v5584_v55, 5  ;;  %v2497_v46 = vsel %vm5375_vm4, %v3759_v33, %v2496_v3  ;;  %v2500_v39 = vsel %vm5375_vm4, %v2498_v52, %v2499_v37 }
  0xe2   : > { %4118 = vmatprep.mubr.bf16.mxu1 %v5483_v26  ;;  %4147 = vmatpush3.bf16.msra.mxu1 %v4897_v9  ;;  %v2518_v40 = vsel %vm5375_vm4, %v3762_v27, %v6316_v61  ;;  %v6317_v26 = vrot.slane %v5430_v23, 5  ;;  %v2431_v9 = vld [vmem:[%s5352_s21 + $0x48] sm:$0xe]  ;;  %v2532_v60 = vsel %vm5375_vm4, %v3764_v36, %v6318_v11  ;;  %v3768_v56 = vrot.slane %v2434_v7, 9  ;;  %v2437_v27 = vld [vmem:[%s5352_s21 + $0x90] sm:$0xe] }
  0xe3   : > { %4148 = vmatprep.subr.bf16.mxu1 %v4899_v18  ;;  %v5862_v21 = vcombine.low %v2518_v40, %v5554_v30  ;;  %v3765_v48 = vrot.slane %v2431_v9, 9  ;;  %v5872_v23 = vcombine.low %v2532_v60, %v5579_v50  ;;  %v2162_v50 = vsel %vm5388_vm5, %v2157_v47, %v5809_v25  ;;  %v2438_v40 = vld [vmem:[%s5352_s21 + $0x9c] sm:$0xe]  ;;  %v6321_v60 = vld [vmem:[#allocation18_spill] sm:$0xff] }
  0xe4   : > { %v2525_v8 = vsel %vm5375_vm4, %v3763_v5, %v6317_v26  ;;  %4323 = vmatmul.mubr.bf16.gmra.mrb[24].mxu0 %v5848_v59  ;;  %v2562_v25 = vrot.slane %v5590_v58, 5  ;;  %v2566_v55 = vrot.slane %v5610_v35, 5  ;;  %v3750_v33 = vcombine.low %v2152_v51, %v2162_v50  ;;  %v2436_v58 = vld [vmem:[%s5352_s21 + $0x84] sm:$0xe]  ;;  %v6320_v26 = vld [vmem:[#allocation28_spill] sm:$0xff] }
  0xe5   : > { %v5865_v57 = vcombine.low %v2525_v8, %v5565_v24  ;;  %v2539_v30 = vsel %vm5375_vm4, %v3765_v48, %v6319_v10  ;;  %v4903_v24 = vld [vmem:[#allocation5 + $0x1b8] sm:$0xff]   ;;  %4326 = vmatprep.mubr.bf16.mxu0 %v5850_v28  ;;  %v2560_v37 = vsel %vm5375_vm4, %v3768_v56, %v2559_v15  ;;  %v3769_v3 = vrot.slane %v2435_v13, 9  ;;  %v6322_v50 = vld [vmem:[#allocation20_spill] sm:$0xff] }
  0xe6   : > { %4149 = vmatpush3.bf16.msra.mxu1 %v4899_v18  ;;  %v5887_v18 = vcombine.low %v2539_v30, %v5598_v6  ;;  %v2561_v6 = vrot.slane %v2559_v15, 4  ;;  %v2573_v63 = vrot.slane %v5637_v62, 5  ;;  %v3775_v52 = vcombine.low %v2497_v46, %v2500_v39  ;;  %v2439_v30 = vld [vmem:[%s5352_s21 + $0xa8] sm:$0xe]  ;;  %v6323_v39 = vld [vmem:[#allocation32_spill] sm:$0xff] }
  0xe7   : > { %4150 = vmatprep.subr.bf16.mxu1 %v4901_v54  ;;  %v2568_v2 = vrot.slane %v2566_v55, 4  ;;  %v2576_v20 = vrot.slane %v5640_v1, 5  ;;  %v3770_v14 = vrot.slane %v2436_v58, 9  ;;  %v3771_v5 = vrot.slane %v2437_v27, 9  ;;  %v4902_v27 = vld [vmem:[#allocation5 + $0x150] sm:$0xff]  }
  0xe8   : > { %v2580_v42 = vrot.slane %v5653_v29, 5  ;;  %v2583_v47 = vrot.slane %v5659_v53, 5  ;;  %v2587_v8 = vrot.slane %v6320_v26, 5  ;;  %v3772_v11 = vrot.slane %v2438_v40, 9  ;;  %v4904_v40 = vld [vmem:[#allocation5 + $0x158] sm:$0xff]  }
  0xe9   : > { %4119 = vmatmul.mubr.bf16.gmra.mrb[12].mxu1 %v5492_v43  ;;  %v2569_v43 = vrot.slane %v5613_v41, 5  ;;  %v2567_v41 = vsel %vm5375_vm4, %v3769_v3, %v2566_v55  ;;  %v2574_v36 = vsel %vm5375_vm4, %v3770_v14, %v2573_v63  ;;  %v2590_v10 = vrot.slane %v5695_v0, 5  ;;  %v1090_v26 = vld [vmem:[%s5352_s21] sm:$0xf] }
  0xea   : > { %4122 = vmatprep.mubr.bf16.mxu1 %v5507_v16  ;;  %4151 = vmatpush3.bf16.msra.mxu1 %v4901_v54  ;;  %v2563_v16 = vsel %vm5375_vm4, %v2561_v6, %v2562_v25  ;;  %v2575_v54 = vrot.slane %v2573_v63, 4  ;;  %v2581_v29 = vsel %vm5375_vm4, %v3771_v5, %v2580_v42  ;;  %v2582_v53 = vrot.slane %v2580_v42, 4  ;;  %v6326_v5 = vld [vmem:[#allocation23_spill] sm:$0xff]  ;;  %v6327_v42 = vld [vmem:[#allocation34_spill] sm:$0xff] }
  0xeb   : > { %4152 = vmatprep.subr.bf16.mxu1 %v4903_v24  ;;  %v5910_v35 = vcombine.low %v2560_v37, %v2563_v16  ;;  %v2570_v62 = vsel %vm5375_vm4, %v2568_v2, %v2569_v43  ;;  %v2589_v48 = vrot.slane %v2587_v8, 4  ;;  %v2597_v51 = vrot.slane %v5707_v34, 5  ;;  %v4900_v37 = vld [vmem:[#allocation5 + $0x148] sm:$0xff]  }
  0xec   : > { %4327 = vmatmul.mubr.bf16.gmra.mrb[28].mxu0 %v3750_v33  ;;  %v5920_v1 = vcombine.low %v2567_v41, %v2570_v62  ;;  %v2577_v61 = vsel %vm5375_vm4, %v2575_v54, %v2576_v20  ;;  %v2584_v7 = vsel %vm5375_vm4, %v2582_v53, %v2583_v47  ;;  %v2588_v15 = vsel %vm5375_vm4, %v3772_v11, %v2587_v8  ;;  %v6324_v41 = vld [vmem:[#allocation33_spill] sm:$0xff]  ;;  %v6325_v54 = vld [vmem:[#allocation22_spill] sm:$0xff]  ;;  %v2432_v11 = vld [vmem:[%s5352_s21 + $0x54] sm:$0xe] }
  0xed   : > { %4346 = vmatprep.mubr.bf16.mxu0 %v3775_v52  ;;  %v5928_v9 = vcombine.low %v2574_v36, %v2577_v61  ;;  %v3773_v46 = vrot.slane %v2439_v30, 9  ;;  %v2601_v56 = vrot.slane %v6323_v39, 5  ;;  %v5943_v6 = vcombine.low %v2581_v29, %v2584_v7  ;;  %v2441_v39 = vld [vmem:[%s5352_s21 + $0xc0] sm:$0xe] }
  0xee   : > { %4153 = vmatpush3.bf16.msra.mxu1 %v4903_v24  ;;  %v2594_v24 = vrot.slane %v5699_v22, 5  ;;  %v2591_v0 = vsel %vm5375_vm4, %v2589_v48, %v2590_v10  ;;  %v2440_v22 = vld [vmem:[%s5352_s21 + $0xb4] sm:$0xe]  ;;  %v2604_v34 = vrot.slane %v5734_v4, 5  ;;  %v1157_v63 = vshll.u32 %v5789_v32, 16 }
  0xef   : > { %4186 = vmatprep.subr.bf16.mxu1 %v5896_v12  ;;  %v5949_v13 = vcombine.low %v2588_v15, %v2591_v0  ;;  %v3774_v43 = vrot.slane %v2440_v22, 9  ;;  %v2603_v33 = vrot.slane %v2601_v56, 4  ;;  %v1161_v2 = vshrl.u32 %v5789_v32, 16  ;;  %v6328_v10 = vld [vmem:[#allocation36_spill] sm:$0xff]  ;;  %v6330_v0 = vld [vmem:[#allocation25_spill] sm:$0xff] }
  0xf0   : > { %v2596_v25 = vrot.slane %v2594_v24, 4  ;;  %v2595_v55 = vsel %vm5375_vm4, %v3773_v46, %v2594_v24  ;;  %v1159_v20 = vrot.slane %v1157_v63, 5  ;;  %v1167_v62 = vshll.u32 %v5792_v19, 16  ;;  %v4928_v24 = vld [vmem:[%s5352_s21 + $0x64] sm:$0xf]  ;;  %v6329_v46 = vld [vmem:[#allocation24_spill] sm:$0xff] }
  0xf1   : > { %4123 = vmatmul.mubr.bf16.gmra.mrb[16].mxu1 %v6321_v60  ;;  %v2602_v16 = vsel %vm5375_vm4, %v3774_v43, %v2601_v56  ;;  %v2605_v4 = vsel %vm5375_vm4, %v2603_v33, %v2604_v34  ;;  %v1163_v14 = vrot.slane %v1161_v2, 4  ;;  %v2933_v47 = vrot.slane %v6327_v42, 5  ;;  %v4927_v60 = vld [vmem:[%s5352_s21 + $0x58] sm:$0xf]  ;;  %v4929_v33 = vld [vmem:[%s5352_s21 + $0x5c] sm:$0x1] }
  0xf2   : > { %4126 = vmatprep.mubr.bf16.mxu1 %v6322_v50  ;;  %v2598_v3 = vsel %vm5375_vm4, %v2596_v25, %v2597_v51  ;;  %v5964_v58 = vcombine.low %v2602_v16, %v2605_v4  ;;  %v1169_v36 = vrot.slane %v1167_v62, 5  ;;  %v1148_v29 = vshrl.u32 %v1090_v26, 16  ;;  %v4906_v50 = vld [vmem:[#allocation5 + $0x160] sm:$0xff]   ;;  %v2433_v25 = vld [vmem:[%s5352_s21 + $0x60] sm:$0xe] }
  0xf3   : > { %v5956_v52 = vcombine.low %v2595_v55, %v2598_v3  ;;  %v1164_v32 = vor.u32 %v1163_v14, %v1159_v20  ;;  %v2935_v8 = vrot.slane %v2933_v47, 4  ;;  %v1151_v53 = vshll.u32 %v1090_v26, 16  ;;  %v4930_v2 = vld [vmem:[%s5352_s21 + $0x68] sm:$0x1]  ;;  %v4908_v14 = vld [vmem:[#allocation5 + $0x168] sm:$0xff]  }
  0xf4   : > { %4347 = vmatmul.mubr.bf16.vlgmr.msra.gmra.mrb[0].mxu0 %v5836_v17  ;;  %v2545_v48 = vrot.slane %v4927_v60, 5  ;;  %v2936_v30 = vrot.slane %v6328_v10, 5  ;;  %v2552_v51 = vrot.slane %v4928_v24, 5  ;;  %v1150_v7 = vrot.slane %v1148_v29, 4  ;;  %v6331_v42 = vld [vmem:[#allocation26_spill] sm:$0xff]  ;;  %v4936_v24 = vld [vmem:[%s5352_s21 + $0x54] sm:$0xff]  }
  0xf5   : > { %4379 = vmatpush3.bf16.msra.mxu0 %v6324_v41  ;;  %4350 = vmatprep.mubr.bf16.mxu0 %v5845_v49  ;;  %v1165_v61 = vrot.slane %v1164_v32, 4  ;;  %v1153_v15 = vrot.slane %v1151_v53, 5  ;;  %v3799_v34 = vrot.slane %v2441_v39, 9  ;;  %v3766_v43 = vrot.slane %v2432_v11, 9  ;;  %v4912_v26 = vld [vmem:[#allocation5 + $0x178] sm:$0xff]   ;;  %v4914_v53 = vld [vmem:[#allocation5 + $0x200] sm:$0xff]  }
  0xf6   : > { %4380 = vmatprep.subr.bf16.mxu0 %v4900_v37  ;;  %v2937_v56 = vsel %vm5375_vm4, %v2935_v8, %v2936_v30  ;;  %v2547_v55 = vrot.slane %v2545_v48, 4  ;;  %v3767_v16 = vrot.slane %v2433_v25, 9  ;;  %v2554_v4 = vrot.slane %v2552_v51, 4  ;;  %v4907_v8 = vld [vmem:[#allocation5 + $0x48] sm:$0xff]   ;;  %v4909_v11 = vld [vmem:[#allocation5 + $0x50] sm:$0xff]   ;;  %v4911_v60 = vld [vmem:[#allocation5 + $0x58] sm:$0xff]  }
  0xf7   : > { %v1170_v19 = vsel %vm5388_vm5, %v1165_v61, %v1169_v36  ;;  %v1154_v22 = vor.u32 %v1153_v15, %v1150_v7  ;;  %v2934_v63 = vsel %vm5375_vm4, %v3799_v34, %v2933_v47  ;;  %v2555_v41 = vrot.slane %v4930_v2, 5  ;;  %v4910_v47 = vld [vmem:[#allocation5 + $0x170] sm:$0xff]   ;;  %v4931_v36 = vld [vmem:[%s5352_s21 + $0x18] sm:$0xff]   ;;  %v4920_v7 = vld [vmem:[#allocation5 + $0x78] sm:$0xff]  }
  0xf8   : > { %v2553_v38 = vsel %vm5375_vm4, %v3767_v16, %v2552_v51  ;;  %v4932_v29 = vld [vmem:[%s5352_s21 + $0x24] sm:$0xff]   ;;  %v4938_v15 = vld [vmem:[%s5352_s21 + $0x6c] sm:$0xff]  }
  0xf9   : > { %4127 = vmatmul.mubr.bf16.gmra.mrb[20].mxu1 %v6325_v54  ;;  %4381 = vmatpush3.bf16.msra.mxu0 %v4900_v37  ;;  %v2548_v37 = vrot.slane %v4929_v33, 5  ;;  %v1155_v3 = vrot.slane %v1154_v22, 4  ;;  %v5991_v54 = vcombine.low %v2934_v63, %v2937_v56  ;;  %v4935_v10 = vld [vmem:[%s5352_s21 + $0x48] sm:$0xff]   ;;  %v4915_v30 = vld [vmem:[#allocation5 + $0x68] sm:$0xff]   ;;  %v4940_v39 = vld [vmem:[#allocation5 + $0x100] sm:$0xff]  }
  0xfa   : > { %4130 = vmatprep.mubr.bf16.mxu1 %v6326_v5  ;;  %4382 = vmatprep.subr.bf16.mxu0 %v4902_v27  ;;  %v2546_v5 = vsel %vm5375_vm4, %v3766_v43, %v2545_v48  ;;  %v4934_v48 = vld [vmem:[%s5352_s21 + $0x3c] sm:$0xff]   ;;  %v4941_v56 = vld [vmem:[%s5352_s21 + $0x84] sm:$0xff]   ;;  %v4945_v43 = vld [vmem:[%s5352_s21 + $0xb4] sm:$0xff]  }
  0xfb   : > { %v2549_v32 = vsel %vm5375_vm4, %v2547_v55, %v2548_v37  ;;  %v4937_v51 = vld [vmem:[%s5352_s21 + $0x60] sm:$0xff]   ;;  %v4944_v55 = vld [vmem:[%s5352_s21 + $0xa8] sm:$0xff]   ;;  %v4922_v33 = vld [vmem:[#allocation5 + $0x220] sm:$0xff]  }
  0xfc   : > { %4351 = vmatmul.mubr.bf16.gmra.mrb[4].mxu0 %v5862_v21  ;;  %v6009_v61 = vcombine.low %v2546_v5, %v2549_v32  ;;  %v4916_v25 = vld [vmem:[#allocation5 + $0x208] sm:$0xff]   ;;  %v4918_v34 = vld [vmem:[#allocation5 + $0x210] sm:$0xff]   ;;  %v6332_v37 = vld [vmem:[#allocation27_spill] sm:$0xff] }
  0xfd   : > { %4354 = vmatprep.mubr.bf16.mxu0 %v5865_v57  ;;  %4383 = vmatpush3.bf16.msra.mxu0 %v4902_v27  ;;  %v1160_v27 = vsel %vm5388_vm5, %v1155_v3, %v1159_v20  ;;  %v2556_v20 = vsel %vm5375_vm4, %v2554_v4, %v2555_v41  ;;  %v4943_v22 = vld [vmem:[%s5352_s21 + $0x9c] sm:$0xff]   ;;  %v4919_v3 = vld [vmem:[%s5352_s21 + $0xcc] sm:$0xff]  }
  0xfe   : > { %4384 = vmatprep.subr.bf16.mxu0 %v4904_v40  ;;  %v5996_v62 = vcombine.low %v1160_v27, %v1170_v19  ;;  %v4933_v19 = vld [vmem:[%s5352_s21 + $0x30] sm:$0xff]   ;;  %v4923_v63 = vld [vmem:[#allocation5 + $0x228] sm:$0xff]   ;;  %v4924_v16 = vld [vmem:[#allocation5 + $0x230] sm:$0xff]  }
  0xff   : > { %v4925_v4 = vld [vmem:[#allocation5 + $0x238] sm:$0xff]   ;;  %v6333_v2 = vld [vmem:[#allocation12_spill] sm:$0xff]  ;;  %v6334_v41 = vld [vmem:[#allocation13_spill] sm:$0xff] }
 0x100   : > { %v4947_v27 = vld [vmem:[#allocation5 + $0x110] sm:$0xff]   ;;  %v6336_v5 = vld [vmem:[#allocation15_spill] sm:$0xff] }
 0x101   : > { %4131 = vmatmul.mubr.bf16.gmra.mrb[24].mxu1 %v6329_v46  ;;  %4385 = vmatpush3.bf16.msra.mxu0 %v4904_v40  ;;  %v6011_v40 = vcombine.low %v2553_v38, %v2556_v20  ;;  %v4939_v46 = vld [vmem:[%s5352_s21 + $0x78] sm:$0xff]   ;;  %v4948_v32 = vld [vmem:[#allocation5 + $0x118] sm:$0xff]  }
 0x102   : > { %4134 = vmatprep.mubr.bf16.mxu1 %v6330_v0  ;;  %4386 = vmatprep.subr.bf16.mxu0 %v4906_v50  ;;  %v4942_v0 = vld [vmem:[%s5352_s21 + $0x90] sm:$0xff]   ;;  %v6338_v20 = vld [vmem:[#allocation17_spill] sm:$0xff] }
 0x103   : > { %v6337_v38 = vld [vmem:[#allocation16_spill] sm:$0xff] }
 0x104   : > { %4355 = vmatmul.mubr.bf16.gmra.mrb[8].mxu0 %v5872_v23 }
 0x105   : > { %4358 = vmatprep.mubr.bf16.mxu0 %v5887_v18  ;;  %4387 = vmatpush3.bf16.msra.mxu0 %v4906_v50  ;;  %v4917_v50 = vld [vmem:[#allocation5 + $0x70] sm:$0xff]  }
 0x106   : > { %4388 = vmatprep.subr.bf16.mxu0 %v4908_v14 }
 0x109   : > { %4135 = vmatmul.mubr.bf16.gmra.mrb[28].mxu1 %v6331_v42  ;;  %4389 = vmatpush3.bf16.msra.mxu0 %v4908_v14  ;;  %v4946_v14 = vld [vmem:[#allocation5 + $0x108] sm:$0xff]   ;;  %v4949_v42 = vld [vmem:[#allocation5 + $0x120] sm:$0xff]  }
 0x10a   : > { %4154 = vmatprep.mubr.bf16.mxu1 %v4931_v36  ;;  %4390 = vmatprep.subr.bf16.mxu0 %v4910_v47  ;;  %v4951_v36 = vld [vmem:[#allocation5 + $0x130] sm:$0xff]  }
 0x10c   : > { %4359 = vmatmul.mubr.bf16.gmra.mrb[12].mxu0 %v6009_v61 }
 0x10d   : > { %4362 = vmatprep.mubr.bf16.mxu0 %v6011_v40  ;;  %4391 = vmatpush3.bf16.msra.mxu0 %v4910_v47  ;;  %v4950_v47 = vld [vmem:[#allocation5 + $0x128] sm:$0xff]  }
 0x10e   : > { %4392 = vmatprep.subr.bf16.mxu0 %v4912_v26 }
 0x111   : > { %4155 = vmatmul.mubr.bf16.vlgmr.msra.gmra.mrb[0].mxu1 %v4932_v29  ;;  %4393 = vmatpush3.bf16.msra.mxu0 %v4912_v26  ;;  %v6339_v26 = vld [vmem:[#allocation19_spill] sm:$0xff] }
 0x112   : > { %4187 = vmatpush3.bf16.msra.mxu1 %v5896_v12  ;;  %4158 = vmatprep.mubr.bf16.mxu1 %v4933_v19  ;;  %v4913_v12 = vld [vmem:[#allocation5 + $0x60] sm:$0xff]   ;;  %v4952_v29 = vld [vmem:[#allocation5 + $0x138] sm:$0xff]  }
 0x113   : > { %4188 = vmatprep.subr.bf16.mxu1 %v4907_v8  ;;  %4426 = vmatprep.subr.bf16.mxu0 %v4914_v53  ;;  %v6342_v19 = vld [vmem:[#allocation30_spill] sm:$0xff] }
 0x114   : > { %4363 = vmatmul.mubr.bf16.gmra.mrb[16].mxu0 %v5910_v35 }
 0x115   : > { %4366 = vmatprep.mubr.bf16.mxu0 %v5920_v1 }
 0x116   : > { %4189 = vmatpush3.bf16.msra.mxu1 %v4907_v8  ;;  %v6340_v8 = vld [vmem:[#allocation21_spill] sm:$0xff] }
 0x117   : > { %4190 = vmatprep.subr.bf16.mxu1 %v4909_v11 }
 0x119   : > { %4159 = vmatmul.mubr.bf16.gmra.mrb[4].mxu1 %v4934_v48 }
 0x11a   : > { %4162 = vmatprep.mubr.bf16.mxu1 %v4935_v10  ;;  %4191 = vmatpush3.bf16.msra.mxu1 %v4909_v11  ;;  %v6343_v11 = vld [vmem:[#allocation31_spill] sm:$0xff] }
 0x11b   : > { %4192 = vmatprep.subr.bf16.mxu1 %v4911_v60 }
 0x11c   : > { %4367 = vmatmul.mubr.bf16.gmra.mrb[20].mxu0 %v5928_v9 }
 0x11d   : > { %4370 = vmatprep.mubr.bf16.mxu0 %v5943_v6 }
 0x11e   : > { %4193 = vmatpush3.bf16.msra.mxu1 %v4911_v60  ;;  %v6344_v60 = vld [vmem:[#allocation35_spill] sm:$0xff] }
 0x11f   : > { %4194 = vmatprep.subr.bf16.mxu1 %v4913_v12 }
 0x121   : > { %4163 = vmatmul.mubr.bf16.gmra.mrb[8].mxu1 %v4936_v24 }
 0x122   : > { %4166 = vmatprep.mubr.bf16.mxu1 %v4937_v51  ;;  %4195 = vmatpush3.bf16.msra.mxu1 %v4913_v12 }
 0x123   : > { %4196 = vmatprep.subr.bf16.mxu1 %v4915_v30 }
 0x124   : > { %4371 = vmatmul.mubr.bf16.gmra.mrb[24].mxu0 %v5949_v13 }
 0x125   : > { %4374 = vmatprep.mubr.bf16.mxu0 %v5956_v52 }
 0x126   : > { %4197 = vmatpush3.bf16.msra.mxu1 %v4915_v30 }
 0x127   : > { %4198 = vmatprep.subr.bf16.mxu1 %v4917_v50 }
 0x129   : > { %4167 = vmatmul.mubr.bf16.gmra.mrb[12].mxu1 %v4938_v15 }
 0x12a   : > { %4170 = vmatprep.mubr.bf16.mxu1 %v4939_v46  ;;  %4199 = vmatpush3.bf16.msra.mxu1 %v4917_v50 }
 0x12b   : > { %4200 = vmatprep.subr.bf16.mxu1 %v4920_v7 }
 0x12c   : > { %4375 = vmatmul.mubr.bf16.gmra.mrb[28].mxu0 %v5964_v58 }
 0x12d   : > { %4394 = vmatprep.mubr.bf16.mxu0 %v5836_v17  ;;  %v4921_v17 = vld [vmem:[#allocation5 + $0x218] sm:$0xff]  }
 0x12e   : > { %4201 = vmatpush3.bf16.msra.mxu1 %v4920_v7 }
 0x12f   : > { %4474 = vmatprep.subr.bf16.mxu1 %v4940_v39 }
 0x131   : > { %4171 = vmatmul.mubr.bf16.gmra.mrb[16].mxu1 %v4941_v56 }
 0x132   : > { %4174 = vmatprep.mubr.bf16.mxu1 %v4942_v0 }
 0x134   : > { %4395 = vmatmul.mubr.bf16.vlgmr.msra.gmra.mrb[0].mxu0 %v5845_v49 }
 0x135   : > { %4427 = vmatpush3.bf16.msra.mxu0 %v4914_v53  ;;  %4398 = vmatprep.mubr.bf16.mxu0 %v5862_v21  ;;  %v6341_v53 = vld [vmem:[#allocation29_spill] sm:$0xff] }
 0x136   : > { %4428 = vmatprep.subr.bf16.mxu0 %v4916_v25 }
 0x139   : > { %4175 = vmatmul.mubr.bf16.gmra.mrb[20].mxu1 %v4943_v22  ;;  %4429 = vmatpush3.bf16.msra.mxu0 %v4916_v25 }
 0x13a   : > { %4178 = vmatprep.mubr.bf16.mxu1 %v4944_v55  ;;  %4430 = vmatprep.subr.bf16.mxu0 %v4918_v34 }
 0x13c   : > { %4399 = vmatmul.mubr.bf16.gmra.mrb[4].mxu0 %v5865_v57 }
 0x13d   : > { %4402 = vmatprep.mubr.bf16.mxu0 %v5872_v23  ;;  %4431 = vmatpush3.bf16.msra.mxu0 %v4918_v34 }
 0x13e   : > { %4432 = vmatprep.subr.bf16.mxu0 %v4921_v17 }
 0x141   : > { %4179 = vmatmul.mubr.bf16.gmra.mrb[24].mxu1 %v4945_v43  ;;  %4433 = vmatpush3.bf16.msra.mxu0 %v4921_v17 }
 0x142   : > { %4182 = vmatprep.mubr.bf16.mxu1 %v6332_v37  ;;  %4434 = vmatprep.subr.bf16.mxu0 %v4922_v33 }
 0x144   : > { %4403 = vmatmul.mubr.bf16.gmra.mrb[8].mxu0 %v5887_v18 }
 0x145   : > { %4406 = vmatprep.mubr.bf16.mxu0 %v6009_v61  ;;  %4435 = vmatpush3.bf16.msra.mxu0 %v4922_v33 }
 0x146   : > { %4436 = vmatprep.subr.bf16.mxu0 %v4923_v63 }
 0x149   : > { %4183 = vmatmul.mubr.bf16.gmra.mrb[28].mxu1 %v4919_v3  ;;  %4437 = vmatpush3.bf16.msra.mxu0 %v4923_v63 }
 0x14a   : > { %4202 = vmatprep.mubr.bf16.mxu1 %v5996_v62  ;;  %4438 = vmatprep.subr.bf16.mxu0 %v4924_v16  ;;  %v6335_v62 = vld [vmem:[#allocation14_spill] sm:$0xff] }
 0x14c   : > { %4407 = vmatmul.mubr.bf16.gmra.mrb[12].mxu0 %v6011_v40 }
 0x14d   : > { %4410 = vmatprep.mubr.bf16.mxu0 %v5910_v35  ;;  %4439 = vmatpush3.bf16.msra.mxu0 %v4924_v16 }
 0x14e   : > { %4440 = vmatprep.subr.bf16.mxu0 %v4925_v4 }
 0x151   : > { %4203 = vmatmul.mubr.bf16.vlgmr.msra.gmra.mrb[0].mxu1 %v6333_v2  ;;  %4441 = vmatpush3.bf16.msra.mxu0 %v4925_v4 }
 0x152   : > { %4482 = vmatpush3.bf16.msra.mxu1 %v4940_v39  ;;  %4206 = vmatprep.mubr.bf16.mxu1 %v6334_v41 }
 0x153   : > { %4475 = vmatprep.subr.bf16.mxu1 %v4946_v14 }
 0x154   : > { %4411 = vmatmul.mubr.bf16.gmra.mrb[16].mxu0 %v5920_v1 }
 0x155   : > { %4414 = vmatprep.mubr.bf16.mxu0 %v5928_v9 }
 0x156   : > { %4483 = vmatpush3.bf16.msra.mxu1 %v4946_v14 }
 0x157   : > { %4476 = vmatprep.subr.bf16.mxu1 %v4947_v27 }
 0x159   : > { %4207 = vmatmul.mubr.bf16.gmra.mrb[4].mxu1 %v6335_v62 }
 0x15a   : > { %4210 = vmatprep.mubr.bf16.mxu1 %v6336_v5  ;;  %4484 = vmatpush3.bf16.msra.mxu1 %v4947_v27 }
 0x15b   : > { %4477 = vmatprep.subr.bf16.mxu1 %v4948_v32 }
 0x15c   : > { %4415 = vmatmul.mubr.bf16.gmra.mrb[20].mxu0 %v5943_v6 }
 0x15d   : > { %4418 = vmatprep.mubr.bf16.mxu0 %v5949_v13 }
 0x15e   : > { %4485 = vmatpush3.bf16.msra.mxu1 %v4948_v32 }
 0x15f   : > { %4478 = vmatprep.subr.bf16.mxu1 %v4949_v42 }
 0x161   : > { %4211 = vmatmul.mubr.bf16.gmra.mrb[8].mxu1 %v6337_v38 }
 0x162   : > { %4214 = vmatprep.mubr.bf16.mxu1 %v6338_v20  ;;  %4486 = vmatpush3.bf16.msra.mxu1 %v4949_v42 }
 0x163   : > { %4479 = vmatprep.subr.bf16.mxu1 %v4950_v47 }
 0x164   : > { %4419 = vmatmul.mubr.bf16.gmra.mrb[24].mxu0 %v5956_v52 }
 0x165   : > { %4422 = vmatprep.mubr.bf16.mxu0 %v5964_v58 }
 0x166   : > { %4487 = vmatpush3.bf16.msra.mxu1 %v4950_v47 }
 0x167   : > { %4480 = vmatprep.subr.bf16.mxu1 %v4951_v36 }
 0x169   : > { %4215 = vmatmul.mubr.bf16.gmra.mrb[12].mxu1 %v6339_v26 }
 0x16a   : > { %4218 = vmatprep.mubr.bf16.mxu1 %v6340_v8  ;;  %4488 = vmatpush3.bf16.msra.mxu1 %v4951_v36 }
 0x16b   : > { %4481 = vmatprep.subr.bf16.mxu1 %v4952_v29 }
 0x16c   : > { %4423 = vmatmul.mubr.bf16.gmra.mrb[28].mxu0 %v5991_v54 }
 0x16d   : > { %4442 = vmatprep.mubr.bf16.mxu0 %v5845_v49  ;;  %v6345_v49 = vld [vmem:[#allocation37_spill] sm:$0xff] }
 0x16e   : > { %4489 = vmatpush3.bf16.msra.mxu1 %v4952_v29 }
 0x171   : > { %4219 = vmatmul.mubr.bf16.gmra.mrb[16].mxu1 %v6341_v53 }
 0x172   : > { %4222 = vmatprep.mubr.bf16.mxu1 %v6342_v19 }
 0x174   : > { %4443 = vmatmul.mubr.bf16.vlgmr.msra.gmra.mrb[0].mxu0 %v5862_v21  ;;  %v3205_v21 = vrot.slane %v6345_v49, 5 }
 0x175   : > { %4446 = vmatprep.mubr.bf16.mxu0 %v5865_v57  ;;  %v2442_v57 = vld [vmem:[%s5352_s21 + $0xcc] sm:$0xe] }
 0x179   : > { %4223 = vmatmul.mubr.bf16.gmra.mrb[20].mxu1 %v6343_v11 }
 0x17a   : > { %4226 = vmatprep.mubr.bf16.mxu1 %v6344_v60 }
 0x17c   : > { %4447 = vmatmul.mubr.bf16.gmra.mrb[4].mxu0 %v5872_v23  ;;  %v3809_v23 = vrot.slane %v2442_v57, 9 }
 0x17d   : > { %4450 = vmatprep.mubr.bf16.mxu0 %v5887_v18  ;;  %v3207_v18 = vrot.slane %v3205_v21, 4 }
 0x181   : > { %4227 = vmatmul.mubr.bf16.gmra.mrb[24].mxu1 %v5794_v45 }
 0x182   : > { %4230 = vmatprep.mubr.bf16.mxu1 %v5805_v44 }
 0x184   : > { %4451 = vmatmul.mubr.bf16.gmra.mrb[8].mxu0 %v6009_v61 }
 0x185   : > { %4454 = vmatprep.mubr.bf16.mxu0 %v6011_v40 }
 0x189   : > { %4231 = vmatmul.mubr.bf16.gmra.mrb[28].mxu1 %v5848_v59 }
 0x18a   : > { %4266 = vmatprep.mubr.bf16.mxu1 %v6341_v53 }
 0x18c   : > { %4455 = vmatmul.mubr.bf16.gmra.mrb[12].mxu0 %v5910_v35  ;;  %v6346_v35 = vld [vmem:[#allocation38_spill] sm:$0xff] }
 0x18d   : > { %4458 = vmatprep.mubr.bf16.mxu0 %v5920_v1  ;;  %v3208_v1 = vrot.slane %v6346_v35, 5 }
 0x191   : > { %4267 = vmatmul.mubr.bf16.vlgmr.msra.gmra.mrb[16].mxu1 %v6342_v19 }
 0x192   : > { %4270 = vmatprep.mubr.bf16.mxu1 %v6343_v11 }
 0x194   : > { %4459 = vmatmul.mubr.bf16.gmra.mrb[16].mxu0 %v5928_v9  ;;  %v3209_v9 = vsel %vm5375_vm4, %v3207_v18, %v3208_v1 }
 0x195   : > { %4462 = vmatprep.mubr.bf16.mxu0 %v5943_v6 }
 0x199   : > { %4271 = vmatmul.mubr.bf16.gmra.mrb[20].mxu1 %v6344_v60 }
 0x19a   : > { %4274 = vmatprep.mubr.bf16.mxu1 %v5794_v45  ;;  %v3206_v45 = vsel %vm5375_vm4, %v3809_v23, %v3205_v21 }
 0x19c   : > { %4463 = vmatmul.mubr.bf16.gmra.mrb[20].mxu0 %v5949_v13 }
 0x19d   : > { %4466 = vmatprep.mubr.bf16.mxu0 %v5956_v52 }
 0x1a1   : > { %4275 = vmatmul.mubr.bf16.gmra.mrb[24].mxu1 %v5805_v44  ;;  %v3810_v44 = vcombine.low %v3206_v45, %v3209_v9 }
 0x1a2   : > { %4278 = vmatprep.mubr.bf16.mxu1 %v5848_v59 }
 0x1a4   : > { %4467 = vmatmul.mubr.bf16.gmra.mrb[24].mxu0 %v5964_v58 }
 0x1a5   : > { %4470 = vmatprep.mubr.bf16.mxu0 %v5991_v54 }
 0x1a9   : > { %4279 = vmatmul.mubr.bf16.gmra.mrb[28].mxu1 %v5850_v28  ;;  %v6103_v28 = vld [vmem:[#allocation7] ss:$0 sm:$0xff] }
 0x1ac   : > { %4471 = vmatmul.mubr.bf16.gmra.mrb[28].mxu0 %v3810_v44 }
 0x224   : > { %v4204_v6 = vpop.f32.mrb[0].mxu1 }
 0x225   : > { %v1694_v59 = vpop.f32.mrb[1].mxu1 }
 0x226   : > { %v4205_v13 = vpop.f32.mrb[2].mxu1 }
 0x227   : > { %v1697_v52 = vpop.f32.mrb[3].mxu1 }
 0x22c   : > { %v4208_v61 = vpop.f32.mrb[4].mxu1 }
 0x22d   : > { %v1710_v40 = vpop.f32.mrb[5].mxu1 }
 0x22e   : > { %v4209_v58 = vpop.f32.mrb[6].mxu1 }
 0x22f   : > { %v1713_v48 = vpop.f32.mrb[7].mxu1 }
 0x234   : > { %v4212_v54 = vpop.f32.mrb[8].mxu1 }
 0x235   : > { %v1726_v10 = vpop.f32.mrb[9].mxu1 }
 0x236   : > { %v4213_v12 = vpop.f32.mrb[10].mxu1 }
 0x237   : > { %v1729_v30 = vpop.f32.mrb[11].mxu1 }
 0x23c   : > { %v4216_v24 = vpop.f32.mrb[12].mxu1 }
 0x23d   : > { %v1742_v31 = vpop.f32.mrb[13].mxu1 }
 0x23e   : > { %v4217_v51 = vpop.f32.mrb[14].mxu1 }
 0x23f   : > { %v6100_v50 = vpop.f32.mrb[15].mxu1 }
 0x247   : > { %v4444_v7 = vpop.f32.mrb[0].mxu0 }
 0x248   : > { %v4490_v15 = vadd.f32 %v4444_v7, %v4204_v6  ;;  %v3313_v46 = vpop.f32.mrb[1].mxu0 }
 0x249   : > { %v4491_v39 = vadd.f32 %v3313_v46, %v1694_v59  ;;  %v4445_v56 = vpop.f32.mrb[2].mxu0 }
 0x24a   : > { %v3480_v0 = vadd.f32 %v4490_v15, %v6103_v28  ;;  %v4492_v25 = vadd.f32 %v4445_v56, %v4205_v13  ;;  %v3316_v22 = vpop.f32.mrb[3].mxu0 }
 0x24b   : > { %v3478_v34 = vadd.f32 %v4491_v39, %v6103_v28  ;;  %v4493_v55 = vadd.f32 %v3316_v22, %v1697_v52 }
 0x24c   : > { %3512 = vst [vmem:[%s6107_s22 + $0x10] sm:$0xff] %v3480_v0  ;;  %v3481_v17 = vadd.f32 %v4492_v25, %v6103_v28 }
 0x24d   : > { %3510 = vst [vmem:[%s6107_s22] sm:$0xff] %v3478_v34  ;;  %v3479_v43 = vadd.f32 %v4493_v55, %v6103_v28 }
 0x24e   : > { %3513 = vst [vmem:[%s6107_s22 + $0x18] sm:$0xff] %v3481_v17 }
 0x24f   : > { %3511 = vst [vmem:[%s6107_s22 + $0x8] sm:$0xff] %v3479_v43  ;;  %v4448_v33 = vpop.f32.mrb[4].mxu0 }
 0x250   : > { %v4494_v37 = vadd.f32 %v4448_v33, %v4208_v61  ;;  %v3329_v3 = vpop.f32.mrb[5].mxu0 }
 0x251   : > { %v4495_v63 = vadd.f32 %v3329_v3, %v1710_v40  ;;  %v4449_v16 = vpop.f32.mrb[6].mxu0 }
 0x252   : > { %v3484_v4 = vadd.f32 %v4494_v37, %v6103_v28  ;;  %v4496_v2 = vadd.f32 %v4449_v16, %v4209_v58  ;;  %v3332_v41 = vpop.f32.mrb[7].mxu0 }
 0x253   : > { %v3482_v14 = vadd.f32 %v4495_v63, %v6103_v28  ;;  %v4497_v27 = vadd.f32 %v3332_v41, %v1713_v48 }
 0x254   : > { %3516 = vst [vmem:[%s6107_s22 + $0x30] sm:$0xff] %v3484_v4  ;;  %v3485_v62 = vadd.f32 %v4496_v2, %v6103_v28 }
 0x255   : > { %3514 = vst [vmem:[%s6107_s22 + $0x20] sm:$0xff] %v3482_v14  ;;  %v3483_v5 = vadd.f32 %v4497_v27, %v6103_v28 }
 0x256   : > { %3517 = vst [vmem:[%s6107_s22 + $0x38] sm:$0xff] %v3485_v62 }
 0x257   : > { %3515 = vst [vmem:[%s6107_s22 + $0x28] sm:$0xff] %v3483_v5  ;;  %v4452_v32 = vpop.f32.mrb[8].mxu0 }
 0x258   : > { %v4498_v42 = vadd.f32 %v4452_v32, %v4212_v54  ;;  %v3345_v38 = vpop.f32.mrb[9].mxu0 }
 0x259   : > { %v4499_v20 = vadd.f32 %v3345_v38, %v1726_v10  ;;  %v4453_v47 = vpop.f32.mrb[10].mxu0 }
 0x25a   : > { %v3488_v36 = vadd.f32 %v4498_v42, %v6103_v28  ;;  %v4500_v26 = vadd.f32 %v4453_v47, %v4213_v12  ;;  %v3348_v8 = vpop.f32.mrb[11].mxu0 }
 0x25b   : > { %v3486_v29 = vadd.f32 %v4499_v20, %v6103_v28  ;;  %v4501_v53 = vadd.f32 %v3348_v8, %v1729_v30 }
 0x25c   : > { %3520 = vst [vmem:[%s6107_s22 + $0x50] sm:$0xff] %v3488_v36  ;;  %v3489_v19 = vadd.f32 %v4500_v26, %v6103_v28 }
 0x25d   : > { %3518 = vst [vmem:[%s6107_s22 + $0x40] sm:$0xff] %v3486_v29  ;;  %v3487_v11 = vadd.f32 %v4501_v53, %v6103_v28 }
 0x25e   : > { %3521 = vst [vmem:[%s6107_s22 + $0x58] sm:$0xff] %v3489_v19 }
 0x25f   : > { %3519 = vst [vmem:[%s6107_s22 + $0x48] sm:$0xff] %v3487_v11  ;;  %v4456_v60 = vpop.f32.mrb[12].mxu0 }
 0x260   : > { %v4502_v49 = vadd.f32 %v4456_v60, %v4216_v24  ;;  %v3361_v21 = vpop.f32.mrb[13].mxu0 }
 0x261   : > { %v4503_v57 = vadd.f32 %v3361_v21, %v1742_v31  ;;  %v4457_v23 = vpop.f32.mrb[14].mxu0 }
 0x262   : > { %v3492_v35 = vadd.f32 %v4502_v49, %v6103_v28  ;;  %v4504_v1 = vadd.f32 %v4457_v23, %v4217_v51  ;;  %v3364_v45 = vpop.f32.mrb[15].mxu0 }
 0x263   : > { %v3490_v44 = vadd.f32 %v4503_v57, %v6103_v28  ;;  %v4505_v6 = vadd.f32 %v3364_v45, %v6100_v50 }
 0x264   : > { %v4268_v18 = vpop.f32.mrb[16].mxu1  ;;  %3524 = vst [vmem:[%s6107_s22 + $0x70] sm:$0xff] %v3492_v35  ;;  %v3493_v13 = vadd.f32 %v4504_v1, %v6103_v28 }
 0x265   : > { %v2044_v9 = vpop.f32.mrb[17].mxu1  ;;  %3522 = vst [vmem:[%s6107_s22 + $0x60] sm:$0xff] %v3490_v44  ;;  %v3491_v61 = vadd.f32 %v4505_v6, %v6103_v28 }
 0x266   : > { %v4269_v59 = vpop.f32.mrb[18].mxu1  ;;  %3525 = vst [vmem:[%s6107_s22 + $0x78] sm:$0xff] %v3493_v13 }
 0x267   : > { %v2047_v52 = vpop.f32.mrb[19].mxu1  ;;  %3523 = vst [vmem:[%s6107_s22 + $0x68] sm:$0xff] %v3491_v61  ;;  %v4460_v40 = vpop.f32.mrb[16].mxu0 }
 0x268   : > { %v4506_v58 = vadd.f32 %v4460_v40, %v4268_v18  ;;  %v3377_v48 = vpop.f32.mrb[17].mxu0 }
 0x269   : > { %v4507_v54 = vadd.f32 %v3377_v48, %v2044_v9  ;;  %v4461_v10 = vpop.f32.mrb[18].mxu0 }
 0x26a   : > { %v3496_v30 = vadd.f32 %v4506_v58, %v6103_v28  ;;  %v4508_v24 = vadd.f32 %v4461_v10, %v4269_v59  ;;  %v3380_v31 = vpop.f32.mrb[19].mxu0 }
 0x26b   : > { %v3494_v50 = vadd.f32 %v4507_v54, %v6103_v28  ;;  %v4509_v7 = vadd.f32 %v3380_v31, %v2047_v52 }
 0x26c   : > { %v4272_v12 = vpop.f32.mrb[20].mxu1  ;;  %3528 = vst [vmem:[%s6107_s22 + $0x90] sm:$0xff] %v3496_v30  ;;  %v3497_v46 = vadd.f32 %v4508_v24, %v6103_v28 }
 0x26d   : > { %v2060_v51 = vpop.f32.mrb[21].mxu1  ;;  %3526 = vst [vmem:[%s6107_s22 + $0x80] sm:$0xff] %v3494_v50  ;;  %v3495_v56 = vadd.f32 %v4509_v7, %v6103_v28 }
 0x26e   : > { %v4273_v15 = vpop.f32.mrb[22].mxu1  ;;  %3529 = vst [vmem:[%s6107_s22 + $0x98] sm:$0xff] %v3497_v46 }
 0x26f   : > { %v2063_v39 = vpop.f32.mrb[23].mxu1  ;;  %3527 = vst [vmem:[%s6107_s22 + $0x88] sm:$0xff] %v3495_v56  ;;  %v4464_v0 = vpop.f32.mrb[20].mxu0 }
 0x270   : > { %v4510_v25 = vadd.f32 %v4464_v0, %v4272_v12  ;;  %v3393_v22 = vpop.f32.mrb[21].mxu0 }
 0x271   : > { %v4511_v34 = vadd.f32 %v3393_v22, %v2060_v51  ;;  %v4465_v55 = vpop.f32.mrb[22].mxu0 }
 0x272   : > { %v3500_v43 = vadd.f32 %v4510_v25, %v6103_v28  ;;  %v4512_v33 = vadd.f32 %v4465_v55, %v4273_v15  ;;  %v3396_v37 = vpop.f32.mrb[23].mxu0 }
 0x273   : > { %v3498_v63 = vadd.f32 %v4511_v34, %v6103_v28  ;;  %v4513_v16 = vadd.f32 %v3396_v37, %v2063_v39 }
 0x274   : > { %v4276_v17 = vpop.f32.mrb[24].mxu1  ;;  %3532 = vst [vmem:[%s6107_s22 + $0xb0] sm:$0xff] %v3500_v43  ;;  %v3501_v2 = vadd.f32 %v4512_v33, %v6103_v28 }
 0x275   : > { %v2076_v3 = vpop.f32.mrb[25].mxu1  ;;  %3530 = vst [vmem:[%s6107_s22 + $0xa0] sm:$0xff] %v3498_v63  ;;  %v3499_v14 = vadd.f32 %v4513_v16, %v6103_v28 }
 0x276   : > { %v4277_v4 = vpop.f32.mrb[26].mxu1  ;;  %3533 = vst [vmem:[%s6107_s22 + $0xb8] sm:$0xff] %v3501_v2 }
 0x277   : > { %v2079_v41 = vpop.f32.mrb[27].mxu1  ;;  %3531 = vst [vmem:[%s6107_s22 + $0xa8] sm:$0xff] %v3499_v14  ;;  %v4468_v27 = vpop.f32.mrb[24].mxu0 }
 0x278   : > { %v4514_v62 = vadd.f32 %v4468_v27, %v4276_v17  ;;  %v3409_v5 = vpop.f32.mrb[25].mxu0 }
 0x279   : > { %v4515_v32 = vadd.f32 %v3409_v5, %v2076_v3  ;;  %v4469_v42 = vpop.f32.mrb[26].mxu0 }
 0x27a   : > { %v3504_v20 = vadd.f32 %v4514_v62, %v6103_v28  ;;  %v4516_v47 = vadd.f32 %v4469_v42, %v4277_v4  ;;  %v3412_v36 = vpop.f32.mrb[27].mxu0 }
 0x27b   : > { %v3502_v8 = vadd.f32 %v4515_v32, %v6103_v28  ;;  %v4517_v29 = vadd.f32 %v3412_v36, %v2079_v41 }
 0x27c   : > { %v4280_v38 = vpop.f32.mrb[28].mxu1  ;;  %3536 = vst [vmem:[%s6107_s22 + $0xd0] sm:$0xff] %v3504_v20  ;;  %v3505_v19 = vadd.f32 %v4516_v47, %v6103_v28 }
 0x27d   : > { %v2092_v26 = vpop.f32.mrb[29].mxu1  ;;  %3534 = vst [vmem:[%s6107_s22 + $0xc0] sm:$0xff] %v3502_v8  ;;  %v3503_v60 = vadd.f32 %v4517_v29, %v6103_v28 }
 0x27e   : > { %v4281_v53 = vpop.f32.mrb[30].mxu1  ;;  %3537 = vst [vmem:[%s6107_s22 + $0xd8] sm:$0xff] %v3505_v19 }
 0x27f   : > { %v2095_v11 = vpop.f32.mrb[31].mxu1  ;;  %3535 = vst [vmem:[%s6107_s22 + $0xc8] sm:$0xff] %v3503_v60  ;;  %v4472_v49 = vpop.f32.mrb[28].mxu0 }
 0x280   : > { %v4518_v21 = vadd.f32 %v4472_v49, %v4280_v38  ;;  %v3425_v57 = vpop.f32.mrb[29].mxu0 }
 0x281   : > { %v4519_v23 = vadd.f32 %v3425_v57, %v2092_v26  ;;  %v4473_v18 = vpop.f32.mrb[30].mxu0 }
 0x282   : > { %v3508_v35 = vadd.f32 %v4518_v21, %v6103_v28  ;;  %v4520_v1 = vadd.f32 %v4473_v18, %v4281_v53  ;;  %v3428_v45 = vpop.f32.mrb[31].mxu0 }
 0x283   : > { %v3506_v9 = vadd.f32 %v4519_v23, %v6103_v28  ;;  %v4521_v44 = vadd.f32 %v3428_v45, %v2095_v11 }
 0x284   : > { %3540 = vst [vmem:[%s6107_s22 + $0xf0] sm:$0xff] %v3508_v35  ;;  %v3509_v6 = vadd.f32 %v4520_v1, %v6103_v28 }
 0x285   : > { %3538 = vst [vmem:[%s6107_s22 + $0xe0] sm:$0xff] %v3506_v9  ;;  %v3507_v59 = vadd.f32 %v4521_v44, %v6103_v28 }
 0x286   : > { %3541 = vst [vmem:[%s6107_s22 + $0xf8] sm:$0xff] %v3509_v6 }
 0x287   : > { %3539 = vst [vmem:[%s6107_s22 + $0xe8] sm:$0xff] %v3507_v59 }
 0x288   : > { %5052 = shalt.err (!%p5049_p2)
}
 0x289   : > { %s5053_s28 = scalar_lea.hbm %s6173_s26, 4096  ;;  %s5057_s8 = scalar_lea.hbm %s6231_s3, 8192 }
 0x28a   : > { %p5054_p0 = scmp.ne.s32.totalorder %s6173_s26, %s5053_s28  ;;  %p5058_p6 = scmp.lt.u32.totalorder %s6173_s26, %s6231_s3 }
 0x28b   : > { %p5059_p7 = scmp.lt.u32.totalorder %s5057_s8, %s5053_s28  ;;  %p5061_p8 = scmp.lt.u32.totalorder %s5053_s28, %s6173_s26 }
 0x28c   : > { %p5055_p4 = pnand %p5054_p0, %p6347_p12 }
 0x28d   : > { %p5060_p11 = por %p5059_p7, %p5058_p6 }
 0x28e   : > { %p5056_p13 = pneg %p5055_p4 }
 0x28f   : > { %p5062_p1 = por %p5061_p8, %p5060_p11 }
 0x291   : > { %p5063_p10 = pnand %p5062_p1, %p5056_p13 }
 0x293   : > { %5066 = shalt.err (!%p5063_p10)
}
 0x294   : > { %s5133_s22 = smov 128   ;;  %s5134_s24 = smov 8  }
 0x295   : > { %4759 = dma.vmem_to_hbm [thread:$0]  (%p6347_p12), %s6175_s11, 4096, %s6173_s26, %s3543_s15, %s5133_s22, %s5133_s22, %s5134_s24  }
 0x296 PF: > { %s3574_s18 = sand.u32 1, %s5105_s12   ;;  %p6348_p3 = scmp.ne.s32.totalorder %s6276_s23, 0 }
 0x297   : > { %p6349_p5 = scmp.ge.s32.totalorder %s5125_s17, 2  ;;  %s3575_s5 = scalar_lea.sflag [#allocation4], %s3574_s18 }
 0x299   : > { %p4773_p9 = pnand %p6349_p5, %p6348_p3 }
 0x29b   : > { %5100 = dma.done.wait (!%p4773_p9), %s3575_s5, 4096  }
 0x29c   : > { %5102 = vsyncadd (!%p4773_p9), %s3575_s5, 4294963200  ;;  %s20_s17 = sadd.s32 1, %s5125_s17   ;;  %s6350_s12 = smov %s5109_s13 }
 0x29d   : > { %p17_p2 = scmp.ge.s32.totalorder %s20_s17, 4   ;;  %s6351_s13 = smov %s5113_s14 }
 0x29e   : > { %s6352_s14 = smov %s5304_s6  ;;  %s6353_s15 = smov %s5121_s16 }
 0x29f   : > { %s6354_s16 = smov %s6356_s25  ;;  %19 = sbr.rel (!%p17_p2) target bundleno = 7 (0x7), region = 94 }
 0x2a6   :  { %3580 = vsyncpa [#allocation3], 1 }
 0x2a7   :  { %3582 = vsyncpa [#allocation3 + $0x1], 1 }
 0x2a8   :  { %3583 = vsyncpa [#allocation6], 1 }
 0x2a9   :  { %3584 = vsyncpa [#allocation4], 1 }
 0x2aa   :  { %3586 = vsyncpa [#allocation4 + $0x1], 1 }

</bundles_post_ra>
